<compile_context>
chip_gen: v6e
topology: v6e:2x2x1
jax: 0.10.0
libtpu: 0.0.40
codegen_flags: <defaults>
</compile_context>

<pallas_src>
import functools

import jax
import jax.numpy as jnp
from jax.experimental import pallas as pl
from jax.experimental.pallas import tpu as pltpu


def _silu(x):
    return x * jax.nn.sigmoid(x)


def _pad8(n):
    return ((n + 7) // 8) * 8


def _bias_layout(Ce, Cse, Cout):
    """Packed bias layout: [b1(Ce) | b2(Ce) | b_se1(Cse) | b_se2(Ce) | b3(Cout)],
    each segment padded to a multiple of 8 sublanes so in-kernel slices stay aligned."""
    sizes = (Ce, Ce, Cse, Ce, Cout)
    offs = []
    o = 0
    for s in sizes:
        offs.append(o)
        o += _pad8(s)
    return tuple(offs), o


def inverted_bottleneck_kernel(
    x_ref,       # (1, Cin, L)            input, channels-in-sublane, batch+spatial in lanes
    w_exp_ref,   # (Ce, Cin)              expand weight, BN1 scale folded in   [mxu dtype]
    w_dw_ref,    # (Ce, KH*KW)            depthwise weight, BN2 scale folded   [f32]
    w_se1_ref,   # (Cse, Ce)              SE reduce weight (transposed)        [f32]
    w_se2_ref,   # (Ce, Cse)              SE expand weight (transposed)        [f32]
    w_proj_ref,  # (Cout, Ce)             project weight, BN3 scale folded in  [mxu dtype]
    bias_ref,    # (Cb, 1)                packed biases (see _bias_layout)     [f32]
    o_ref,       # (1, Cout, L)           output                               [f32]
    *, H, W, KH, KW, pad, B_blk, skip, bias_offs,
):
    Ce = w_exp_ref.shape[0]
    Cse = w_se1_ref.shape[0]
    Cout = w_proj_ref.shape[0]
    N = H * W
    L = B_blk * N

    o_b1, o_b2, o_se1, o_se2, o_b3 = bias_offs
    b1 = bias_ref[o_b1:o_b1 + Ce, :]
    b2 = bias_ref[o_b2:o_b2 + Ce, :]
    b_se1 = bias_ref[o_se1:o_se1 + Cse, :]
    b_se2 = bias_ref[o_se2:o_se2 + Ce, :]
    b3 = bias_ref[o_b3:o_b3 + Cout, :]

    x = x_ref[0]                                               # (Cin, L)

    # ---- expand 1x1 conv (BN scale folded) + bias + SiLU ----
    h = jnp.dot(w_exp_ref[...], x, preferred_element_type=jnp.float32)
    h = _silu(h + b1)                                          # (Ce, L) f32

    # ---- lane coordinate tables (in-kernel iota, no DMA'd pos table) ----
    lane = jax.lax.broadcasted_iota(jnp.int32, (1, L), 1)
    bidx = None
    if (W & (W - 1)) == 0 and (H & (H - 1)) == 0:
        lw = W.bit_length() - 1
        ln = (H * W).bit_length() - 1
        xpos = lane & (W - 1)
        ypos = (lane >> lw) & (H - 1)
        if B_blk > 1:
            bidx = lane >> ln
    else:
        # TODO(synk): non-power-of-two spatial dims fall back to vector int div/mod.
        img = lane % N
        ypos = img // W
        xpos = img - ypos * W
        if B_blk > 1:
            bidx = lane // N

    # Elementary boundary masks, computed once (4 compares for a 3x3 kernel).
    ym, xm = {}, {}
    for dy in range(KH):
        oy = dy - pad
        if oy < 0:
            ym[oy] = ypos >= -oy
        elif oy > 0:
            ym[oy] = ypos <= H - 1 - oy
    for dx in range(KW):
        ox = dx - pad
        if ox < 0:
            xm[ox] = xpos >= -ox
        elif ox > 0:
            xm[ox] = xpos <= W - 1 - ox

    # ---- depthwise KxK conv, stride=1: roll-in-registers + boundary select ----
    # Rolling across image boundaries / the array end is harmless: every lane
    # whose tap would read a wrong position is zeroed by the y/x masks.
    w_dw = w_dw_ref[...]                                       # hoisted single read
    acc = None
    for dy in range(KH):
        oy = dy - pad
        for dx in range(KW):
            ox = dx - pad
            tap = dy * KW + dx
            d = oy * W + ox
            v = h if d == 0 else pltpu.roll(h, shift=(-d) % L, axis=1)
            v = v * w_dw[:, tap:tap + 1]
            m = None
            if oy != 0:
                m = ym[oy]
            if ox != 0:
                m = xm[ox] if m is None else (m & xm[ox])
            if m is not None:
                v = jnp.where(m, v, 0.0)
            acc = v if acc is None else acc + v                # first tap inits acc
    acc = _silu(acc + b2)                                      # (Ce, L) f32

    # ---- squeeze-and-excitation: per-image pool / gate (f32 throughout) ----
    w_se1 = w_se1_ref[...]
    w_se2 = w_se2_ref[...]
    inv_hw = 1.0 / float(N)
    gate = None
    mb = None
    for b in range(B_blk):
        if B_blk == 1:
            s_b = jnp.sum(acc, axis=1, keepdims=True) * inv_hw            # (Ce, 1)
        else:
            mb = bidx == b
            s_b = jnp.sum(jnp.where(mb, acc, 0.0), axis=1, keepdims=True) * inv_hw
        z_b = _silu(jnp.dot(w_se1, s_b, preferred_element_type=jnp.float32) + b_se1)
        g_b = jax.nn.sigmoid(jnp.dot(w_se2, z_b, preferred_element_type=jnp.float32) + b_se2)
        gate = g_b if gate is None else jnp.where(mb, g_b, gate)
    acc = acc * gate                                           # per-channel, per-image gate

    # ---- project 1x1 conv (BN scale folded) + bias, no activation ----
    out = jnp.dot(w_proj_ref[...], acc.astype(w_proj_ref.dtype),
                  preferred_element_type=jnp.float32)
    out = out + b3                                             # (Cout, L)

    if skip:
        # eval mode: stochastic_depth(out) == out -> plain residual add
        out = out + x.astype(jnp.float32)

    o_ref[0] = out


def inverted_bottleneck(x_nchw, params, *, kernel_size, padding, stride, skip,
                        num_blocks=1, mxu_dtype=jnp.float32):
    """num_blocks=1: whole batch in one grid step (v5e/v6e single-TC).
       num_blocks=2: two 'parallel' steps (v7x, 2 TensorCores/chip).
       mxu_dtype=jnp.bfloat16: fast MXU path on v6e/v7x (elementwise stays f32)."""
    assert stride == 1, "kernel implements the stride=1 / residual configuration"
    B, Cin, H, W = x_nchw.shape
    N = H * W
    K = kernel_size
    assert B % num_blocks == 0
    B_blk = B // num_blocks
    L = B_blk * N

    Ce = params["w_exp"].shape[1]
    Cse = params["w_se1"].shape[1]
    Cout = params["w_proj"].shape[1]
    if skip:
        assert Cin == Cout
    f32 = jnp.float32

    # Flatten batch into the lane axis: (num_blocks, Cin, B_blk*H*W).
    x = (x_nchw.reshape(num_blocks, B_blk, Cin, N)
         .transpose(0, 2, 1, 3)
         .reshape(num_blocks, Cin, L)
         .astype(mxu_dtype))

    # Fold BN scales into the conv weights (host side); keep only bias adds in-kernel.
    w_exp = (params["w_exp"] * params["sb1"][0][None, :]).T.astype(mxu_dtype)    # (Ce, Cin)
    w_dw = (params["w_dw"].reshape(K * K, Ce)
            * params["sb2"][0][None, :]).T.astype(f32)                           # (Ce, K*K)
    w_se1 = params["w_se1"].T.astype(f32)                                        # (Cse, Ce)
    w_se2 = params["w_se2"].T.astype(f32)                                        # (Ce, Cse)
    w_proj = (params["w_proj"] * params["sb3"][0][None, :]).T.astype(mxu_dtype)  # (Cout, Ce)

    # Pack the five bias vectors into a single (Cb, 1) input.
    bias_offs, bias_tot = _bias_layout(Ce, Cse, Cout)
    segs = ((params["sb1"][1], Ce),
            (params["sb2"][1], Ce),
            (params["b_se1"].reshape(Cse), Cse),
            (params["b_se2"].reshape(Ce), Ce),
            (params["sb3"][1], Cout))
    parts = []
    for vec, c in segs:
        seg = vec.reshape(c, 1).astype(f32)
        pc = _pad8(c)
        if pc != c:
            seg = jnp.pad(seg, ((0, pc - c), (0, 0)))
        parts.append(seg)
    bias_packed = jnp.concatenate(parts, axis=0)               # (bias_tot, 1)

    kernel = functools.partial(
        inverted_bottleneck_kernel,
        H=H, W=W, KH=K, KW=K, pad=padding, B_blk=B_blk, skip=skip,
        bias_offs=bias_offs)

    grid_spec = pltpu.PrefetchScalarGridSpec(
        num_scalar_prefetch=0,
        grid=(num_blocks,),
        in_specs=[
            pl.BlockSpec((1, Cin, L), lambda g: (g, 0, 0)),
            pl.BlockSpec((Ce, Cin), lambda g: (0, 0)),
            pl.BlockSpec((Ce, K * K), lambda g: (0, 0)),
            pl.BlockSpec((Cse, Ce), lambda g: (0, 0)),
            pl.BlockSpec((Ce, Cse), lambda g: (0, 0)),
            pl.BlockSpec((Cout, Ce), lambda g: (0, 0)),
            pl.BlockSpec((bias_tot, 1), lambda g: (0, 0)),
        ],
        out_specs=pl.BlockSpec((1, Cout, L), lambda g: (g, 0, 0)),
    )

    out = pl.pallas_call(
        kernel,
        out_shape=jax.ShapeDtypeStruct((num_blocks, Cout, L), f32),
        grid_spec=grid_spec,
        compiler_params=pltpu.CompilerParams(dimension_semantics=("parallel",)),
    )(x, w_exp, w_dw, w_se1, w_se2, w_proj, bias_packed)

    return (out.reshape(num_blocks, Cout, B_blk, N)
            .transpose(0, 2, 1, 3)
            .reshape(B, Cout, H, W))                           # NCHW


# ------------------------- pure-JAX reference (NCHW) -------------------------
def reference_forward(x, p, K, pad, skip):
    sb1, sb2, sb3 = p["sb1"], p["sb2"], p["sb3"]
    h = jnp.einsum("bchw,cd->bdhw", x, p["w_exp"])
    h = h * sb1[0][None, :, None, None] + sb1[1][None, :, None, None]
    h = jax.nn.silu(h)
    B, Ce, H, W = h.shape
    hp = jnp.pad(h, ((0, 0), (0, 0), (pad, pad), (pad, pad)))
    acc = jnp.zeros_like(h)
    for dy in range(K):
        for dx in range(K):
            acc = acc + hp[:, :, dy:dy + H, dx:dx + W] * p["w_dw"][dy, dx][None, :, None, None]
    acc = jax.nn.silu(acc * sb2[0][None, :, None, None] + sb2[1][None, :, None, None])
    s = acc.mean(axis=(2, 3))                                  # (B, Ce)
    z = jax.nn.silu(s @ p["w_se1"] + p["b_se1"][0])
    g = jax.nn.sigmoid(z @ p["w_se2"] + p["b_se2"][0])
    acc = acc * g[:, :, None, None]
    out = jnp.einsum("bchw,cd->bdhw", acc, p["w_proj"])
    out = out * sb3[0][None, :, None, None] + sb3[1][None, :, None, None]
    if skip:
        out = out + x
    return out


# ------------------------------- parameter init -------------------------------
def fold_bn(gamma, beta, mean, var, eps=1e-5):
    scale = gamma / jnp.sqrt(var + eps)
    bias = beta - mean * scale
    return jnp.stack([scale, bias], axis=0)   # (2, C)


def make_params(key, Cin, Cout, Ce, Cse, K):
    ks = jax.random.split(key, 16)
    p = {}
    p["w_exp"] = jax.random.normal(ks[0], (Cin, Ce), jnp.float32) / jnp.sqrt(Cin)
    p["sb1"] = fold_bn(
        jax.random.uniform(ks[1], (Ce,), minval=0.5, maxval=1.5),
        0.1 * jax.random.normal(ks[2], (Ce,)),
        0.1 * jax.random.normal(ks[3], (Ce,)),
        jax.random.uniform(ks[4], (Ce,), minval=0.5, maxval=1.5))
    p["w_dw"] = jax.random.normal(ks[5], (K, K, Ce), jnp.float32) / K
    p["sb2"] = fold_bn(
        jax.random.uniform(ks[6], (Ce,), minval=0.5, maxval=1.5),
        0.1 * jax.random.normal(ks[7], (Ce,)),
        0.1 * jax.random.normal(ks[8], (Ce,)),
        jax.random.uniform(ks[9], (Ce,), minval=0.5, maxval=1.5))
    p["w_se1"] = jax.random.normal(ks[10], (Ce, Cse), jnp.float32) / jnp.sqrt(Ce)
    p["b_se1"] = 0.1 * jax.random.normal(ks[11], (1, Cse), jnp.float32)
    p["w_se2"] = jax.random.normal(ks[12], (Cse, Ce), jnp.float32) / jnp.sqrt(Cse)
    p["b_se2"] = 0.1 * jax.random.normal(ks[13], (1, Ce), jnp.float32)
    p["w_proj"] = jax.random.normal(ks[14], (Ce, Cout), jnp.float32) / jnp.sqrt(Ce)
    p["sb3"] = fold_bn(
        jax.random.uniform(ks[15], (Cout,), minval=0.5, maxval=1.5),
        jnp.zeros((Cout,)), jnp.zeros((Cout,)), jnp.ones((Cout,)))
    return p


if __name__ == "__main__":
    # Module config: Inverted_bottleneck(in=4, out=4, expansion_factor=4,
    #                                    kernel_size=3, padding=1, reduction_ratio=4, stride=1)
    in_channels, out_channels = 4, 4
    expansion_factor, kernel_size, padding, reduction_ratio, stride = 4, 3, 1, 4, 1
    Ce = expansion_factor * in_channels          # 16
    Cse = Ce // reduction_ratio                  # 4
    skip = (in_channels == out_channels) and (stride == 1)

    key = jax.random.PRNGKey(0)
    k_x, k_p = jax.random.split(key)
    x = jax.random.normal(k_x, (2, in_channels, 16, 16), jnp.float32)   # NCHW input
    params = make_params(k_p, in_channels, out_channels, Ce, Cse, kernel_size)

    ref = reference_forward(x, params, kernel_size, padding, skip)

    # (a) Fully fused: whole batch in ONE grid step (single-TC v5e / v6e layout), f32 MXU.
    out = inverted_bottleneck(x, params, kernel_size=kernel_size, padding=padding,
                              stride=stride, skip=skip, num_blocks=1)
    out = jax.block_until_ready(out)
    assert out.shape == (2, out_channels, 16, 16)
    assert jnp.allclose(out, ref, atol=2e-4, rtol=2e-4), "mismatch vs reference (num_blocks=1)"

    # (b) Two parallel grid steps (v7x 2-TensorCore layout), f32 MXU.
    out2 = jax.block_until_ready(
        inverted_bottleneck(x, params, kernel_size=kernel_size, padding=padding,
                            stride=stride, skip=skip, num_blocks=2))
    assert jnp.allclose(out2, ref, atol=2e-4, rtol=2e-4), "mismatch vs reference (num_blocks=2)"

    # (c) bf16 MXU operands (v6e / v7x fast path); elementwise/SE math stays f32.
    out_bf = jax.block_until_ready(
        inverted_bottleneck(x, params, kernel_size=kernel_size, padding=padding,
                            stride=stride, skip=skip, num_blocks=1,
                            mxu_dtype=jnp.bfloat16))
    assert jnp.all(jnp.isfinite(out_bf))
    assert jnp.allclose(out_bf, ref, atol=2e-1, rtol=1e-1), "mismatch vs reference (bf16 MXU)"

    print("KERNEL_OK")
</pallas_src>

<mosaic_0001>
module attributes {stable_mosaic.version = 11 : i64} {
  func.func @inverted_bottleneck_kernel(%arg0: i32, %arg1: memref<1x4x512xf32, #tpu.memory_space<vmem>>, %arg2: memref<16x4xf32, #tpu.memory_space<vmem>>, %arg3: memref<16x9xf32, #tpu.memory_space<vmem>>, %arg4: memref<4x16xf32, #tpu.memory_space<vmem>>, %arg5: memref<16x4xf32, #tpu.memory_space<vmem>>, %arg6: memref<4x16xf32, #tpu.memory_space<vmem>>, %arg7: memref<64x1xf32, #tpu.memory_space<vmem>>, %arg8: memref<1x4x512xf32, #tpu.memory_space<vmem>>) attributes {dimension_semantics = [#tpu.dimension_semantics<parallel>], iteration_bounds = array<i64: 1>, scalar_prefetch = 0 : i64, scratch_operands = 0 : i64, tpu.core_type = #tpu.core_type<tc>, window_params = [{transform_indices = @transform_0, window_bounds = array<i64: 1, 4, 512>}, {pipeline_mode = #tpu.pipeline_mode<synchronous>, transform_indices = @transform_1, window_bounds = array<i64: 16, 4>}, {pipeline_mode = #tpu.pipeline_mode<synchronous>, transform_indices = @transform_2, window_bounds = array<i64: 16, 9>}, {pipeline_mode = #tpu.pipeline_mode<synchronous>, transform_indices = @transform_3, window_bounds = array<i64: 4, 16>}, {pipeline_mode = #tpu.pipeline_mode<synchronous>, transform_indices = @transform_4, window_bounds = array<i64: 16, 4>}, {pipeline_mode = #tpu.pipeline_mode<synchronous>, transform_indices = @transform_5, window_bounds = array<i64: 4, 16>}, {pipeline_mode = #tpu.pipeline_mode<synchronous>, transform_indices = @transform_6, window_bounds = array<i64: 64, 1>}, {transform_indices = @transform_7, window_bounds = array<i64: 1, 4, 512>}]} {
    %c0 = arith.constant 0 : index
    %c0_0 = arith.constant 0 : index
    %0 = vector.load %arg7[%c0, %c0_0] : memref<64x1xf32, #tpu.memory_space<vmem>>, vector<16x1xf32>
    %c16 = arith.constant 16 : index
    %c0_1 = arith.constant 0 : index
    %1 = vector.load %arg7[%c16, %c0_1] : memref<64x1xf32, #tpu.memory_space<vmem>>, vector<16x1xf32>
    %c32 = arith.constant 32 : index
    %c0_2 = arith.constant 0 : index
    %2 = vector.load %arg7[%c32, %c0_2] : memref<64x1xf32, #tpu.memory_space<vmem>>, vector<4x1xf32>
    %c40 = arith.constant 40 : index
    %c0_3 = arith.constant 0 : index
    %3 = vector.load %arg7[%c40, %c0_3] : memref<64x1xf32, #tpu.memory_space<vmem>>, vector<16x1xf32>
    %c56 = arith.constant 56 : index
    %c0_4 = arith.constant 0 : index
    %4 = vector.load %arg7[%c56, %c0_4] : memref<64x1xf32, #tpu.memory_space<vmem>>, vector<4x1xf32>
    %c0_5 = arith.constant 0 : index
    %c0_6 = arith.constant 0 : index
    %c0_7 = arith.constant 0 : index
    %5 = vector.load %arg1[%c0_5, %c0_6, %c0_7] : memref<1x4x512xf32, #tpu.memory_space<vmem>>, vector<1x4x512xf32>
    %6 = vector.shape_cast %5 : vector<1x4x512xf32> to vector<4x512xf32>
    %c0_8 = arith.constant 0 : index
    %c0_9 = arith.constant 0 : index
    %7 = vector.load %arg2[%c0_8, %c0_9] : memref<16x4xf32, #tpu.memory_space<vmem>>, vector<16x4xf32>
    %cst = arith.constant dense<0.000000e+00> : vector<16x512xf32>
    %8 = tpu.matmul %7, %6, %cst {dimension_numbers = #tpu.dot_dimension_numbers<[1], [0], [0], [1], [0, 0, 1, 1], [], []>} : vector<16x4xf32>, vector<4x512xf32>, vector<16x512xf32> -> vector<16x512xf32>
    %9 = vector.broadcast %0 : vector<16x1xf32> to vector<16x512xf32>
    %10 = arith.addf %8, %9 : vector<16x512xf32>
    %11 = arith.negf %10 : vector<16x512xf32>
    %12 = math.exp %11 : vector<16x512xf32>
    %cst_10 = arith.constant 1.000000e+00 : f32
    %13 = vector.broadcast %cst_10 : f32 to vector<16x512xf32>
    %14 = arith.addf %13, %12 : vector<16x512xf32>
    %15 = arith.divf %13, %14 : vector<16x512xf32>
    %16 = arith.mulf %10, %15 : vector<16x512xf32>
    %17 = tpu.iota {dimensions = array<i32: 1>} : vector<1x512xi32>
    %c15_i32 = arith.constant 15 : i32
    %18 = vector.broadcast %c15_i32 : i32 to vector<1x512xi32>
    %19 = arith.andi %17, %18 : vector<1x512xi32>
    %c4_i32 = arith.constant 4 : i32
    %20 = vector.broadcast %c4_i32 : i32 to vector<1x512xi32>
    %21 = arith.shrsi %17, %20 : vector<1x512xi32>
    %c15_i32_11 = arith.constant 15 : i32
    %22 = vector.broadcast %c15_i32_11 : i32 to vector<1x512xi32>
    %23 = arith.andi %21, %22 : vector<1x512xi32>
    %c8_i32 = arith.constant 8 : i32
    %24 = vector.broadcast %c8_i32 : i32 to vector<1x512xi32>
    %25 = arith.shrsi %17, %24 : vector<1x512xi32>
    %c1_i32 = arith.constant 1 : i32
    %26 = vector.broadcast %c1_i32 : i32 to vector<1x512xi32>
    %27 = arith.cmpi sge, %23, %26 : vector<1x512xi32>
    %c14_i32 = arith.constant 14 : i32
    %28 = vector.broadcast %c14_i32 : i32 to vector<1x512xi32>
    %29 = arith.cmpi sle, %23, %28 : vector<1x512xi32>
    %c1_i32_12 = arith.constant 1 : i32
    %30 = vector.broadcast %c1_i32_12 : i32 to vector<1x512xi32>
    %31 = arith.cmpi sge, %19, %30 : vector<1x512xi32>
    %c14_i32_13 = arith.constant 14 : i32
    %32 = vector.broadcast %c14_i32_13 : i32 to vector<1x512xi32>
    %33 = arith.cmpi sle, %19, %32 : vector<1x512xi32>
    %c0_14 = arith.constant 0 : index
    %c0_15 = arith.constant 0 : index
    %34 = vector.load %arg3[%c0_14, %c0_15] : memref<16x9xf32, #tpu.memory_space<vmem>>, vector<16x9xf32>
    %c17_i32 = arith.constant 17 : i32
    %35 = tpu.dynamic_rotate %16 by %c17_i32 dim 1 : vector<16x512xf32>, i32 -> vector<16x512xf32>
    %36 = vector.extract_strided_slice %34 {offsets = [0, 0], sizes = [16, 1], strides = [1, 1]} : vector<16x9xf32> to vector<16x1xf32>
    %37 = vector.broadcast %36 : vector<16x1xf32> to vector<16x512xf32>
    %38 = arith.mulf %35, %37 : vector<16x512xf32>
    %39 = arith.andi %27, %31 : vector<1x512xi1>
    %cst_16 = arith.constant 0.000000e+00 : f32
    %40 = vector.shape_cast %39 : vector<1x512xi1> to vector<1x512xi1>
    %41 = vector.broadcast %40 : vector<1x512xi1> to vector<16x512xi1>
    %42 = vector.broadcast %cst_16 : f32 to vector<16x512xf32>
    %43 = arith.select %41, %38, %42 : vector<16x512xi1>, vector<16x512xf32>
    %c16_i32 = arith.constant 16 : i32
    %44 = tpu.dynamic_rotate %16 by %c16_i32 dim 1 : vector<16x512xf32>, i32 -> vector<16x512xf32>
    %45 = vector.extract_strided_slice %34 {offsets = [0, 1], sizes = [16, 1], strides = [1, 1]} : vector<16x9xf32> to vector<16x1xf32>
    %46 = vector.broadcast %45 : vector<16x1xf32> to vector<16x512xf32>
    %47 = arith.mulf %44, %46 : vector<16x512xf32>
    %cst_17 = arith.constant 0.000000e+00 : f32
    %48 = vector.shape_cast %27 : vector<1x512xi1> to vector<1x512xi1>
    %49 = vector.broadcast %48 : vector<1x512xi1> to vector<16x512xi1>
    %50 = vector.broadcast %cst_17 : f32 to vector<16x512xf32>
    %51 = arith.select %49, %47, %50 : vector<16x512xi1>, vector<16x512xf32>
    %52 = arith.addf %43, %51 : vector<16x512xf32>
    %c15_i32_18 = arith.constant 15 : i32
    %53 = tpu.dynamic_rotate %16 by %c15_i32_18 dim 1 : vector<16x512xf32>, i32 -> vector<16x512xf32>
    %54 = vector.extract_strided_slice %34 {offsets = [0, 2], sizes = [16, 1], strides = [1, 1]} : vector<16x9xf32> to vector<16x1xf32>
    %55 = vector.broadcast %54 : vector<16x1xf32> to vector<16x512xf32>
    %56 = arith.mulf %53, %55 : vector<16x512xf32>
    %57 = arith.andi %27, %33 : vector<1x512xi1>
    %cst_19 = arith.constant 0.000000e+00 : f32
    %58 = vector.shape_cast %57 : vector<1x512xi1> to vector<1x512xi1>
    %59 = vector.broadcast %58 : vector<1x512xi1> to vector<16x512xi1>
    %60 = vector.broadcast %cst_19 : f32 to vector<16x512xf32>
    %61 = arith.select %59, %56, %60 : vector<16x512xi1>, vector<16x512xf32>
    %62 = arith.addf %52, %61 : vector<16x512xf32>
    %c1_i32_20 = arith.constant 1 : i32
    %63 = tpu.dynamic_rotate %16 by %c1_i32_20 dim 1 : vector<16x512xf32>, i32 -> vector<16x512xf32>
    %64 = vector.extract_strided_slice %34 {offsets = [0, 3], sizes = [16, 1], strides = [1, 1]} : vector<16x9xf32> to vector<16x1xf32>
    %65 = vector.broadcast %64 : vector<16x1xf32> to vector<16x512xf32>
    %66 = arith.mulf %63, %65 : vector<16x512xf32>
    %cst_21 = arith.constant 0.000000e+00 : f32
    %67 = vector.shape_cast %31 : vector<1x512xi1> to vector<1x512xi1>
    %68 = vector.broadcast %67 : vector<1x512xi1> to vector<16x512xi1>
    %69 = vector.broadcast %cst_21 : f32 to vector<16x512xf32>
    %70 = arith.select %68, %66, %69 : vector<16x512xi1>, vector<16x512xf32>
    %71 = arith.addf %62, %70 : vector<16x512xf32>
    %72 = vector.extract_strided_slice %34 {offsets = [0, 4], sizes = [16, 1], strides = [1, 1]} : vector<16x9xf32> to vector<16x1xf32>
    %73 = vector.broadcast %72 : vector<16x1xf32> to vector<16x512xf32>
    %74 = arith.mulf %16, %73 : vector<16x512xf32>
    %75 = arith.addf %71, %74 : vector<16x512xf32>
    %c511_i32 = arith.constant 511 : i32
    %76 = tpu.dynamic_rotate %16 by %c511_i32 dim 1 : vector<16x512xf32>, i32 -> vector<16x512xf32>
    %77 = vector.extract_strided_slice %34 {offsets = [0, 5], sizes = [16, 1], strides = [1, 1]} : vector<16x9xf32> to vector<16x1xf32>
    %78 = vector.broadcast %77 : vector<16x1xf32> to vector<16x512xf32>
    %79 = arith.mulf %76, %78 : vector<16x512xf32>
    %cst_22 = arith.constant 0.000000e+00 : f32
    %80 = vector.shape_cast %33 : vector<1x512xi1> to vector<1x512xi1>
    %81 = vector.broadcast %80 : vector<1x512xi1> to vector<16x512xi1>
    %82 = vector.broadcast %cst_22 : f32 to vector<16x512xf32>
    %83 = arith.select %81, %79, %82 : vector<16x512xi1>, vector<16x512xf32>
    %84 = arith.addf %75, %83 : vector<16x512xf32>
    %c497_i32 = arith.constant 497 : i32
    %85 = tpu.dynamic_rotate %16 by %c497_i32 dim 1 : vector<16x512xf32>, i32 -> vector<16x512xf32>
    %86 = vector.extract_strided_slice %34 {offsets = [0, 6], sizes = [16, 1], strides = [1, 1]} : vector<16x9xf32> to vector<16x1xf32>
    %87 = vector.broadcast %86 : vector<16x1xf32> to vector<16x512xf32>
    %88 = arith.mulf %85, %87 : vector<16x512xf32>
    %89 = arith.andi %29, %31 : vector<1x512xi1>
    %cst_23 = arith.constant 0.000000e+00 : f32
    %90 = vector.shape_cast %89 : vector<1x512xi1> to vector<1x512xi1>
    %91 = vector.broadcast %90 : vector<1x512xi1> to vector<16x512xi1>
    %92 = vector.broadcast %cst_23 : f32 to vector<16x512xf32>
    %93 = arith.select %91, %88, %92 : vector<16x512xi1>, vector<16x512xf32>
    %94 = arith.addf %84, %93 : vector<16x512xf32>
    %c496_i32 = arith.constant 496 : i32
    %95 = tpu.dynamic_rotate %16 by %c496_i32 dim 1 : vector<16x512xf32>, i32 -> vector<16x512xf32>
    %96 = vector.extract_strided_slice %34 {offsets = [0, 7], sizes = [16, 1], strides = [1, 1]} : vector<16x9xf32> to vector<16x1xf32>
    %97 = vector.broadcast %96 : vector<16x1xf32> to vector<16x512xf32>
    %98 = arith.mulf %95, %97 : vector<16x512xf32>
    %cst_24 = arith.constant 0.000000e+00 : f32
    %99 = vector.shape_cast %29 : vector<1x512xi1> to vector<1x512xi1>
    %100 = vector.broadcast %99 : vector<1x512xi1> to vector<16x512xi1>
    %101 = vector.broadcast %cst_24 : f32 to vector<16x512xf32>
    %102 = arith.select %100, %98, %101 : vector<16x512xi1>, vector<16x512xf32>
    %103 = arith.addf %94, %102 : vector<16x512xf32>
    %c495_i32 = arith.constant 495 : i32
    %104 = tpu.dynamic_rotate %16 by %c495_i32 dim 1 : vector<16x512xf32>, i32 -> vector<16x512xf32>
    %105 = vector.extract_strided_slice %34 {offsets = [0, 8], sizes = [16, 1], strides = [1, 1]} : vector<16x9xf32> to vector<16x1xf32>
    %106 = vector.broadcast %105 : vector<16x1xf32> to vector<16x512xf32>
    %107 = arith.mulf %104, %106 : vector<16x512xf32>
    %108 = arith.andi %29, %33 : vector<1x512xi1>
    %cst_25 = arith.constant 0.000000e+00 : f32
    %109 = vector.shape_cast %108 : vector<1x512xi1> to vector<1x512xi1>
    %110 = vector.broadcast %109 : vector<1x512xi1> to vector<16x512xi1>
    %111 = vector.broadcast %cst_25 : f32 to vector<16x512xf32>
    %112 = arith.select %110, %107, %111 : vector<16x512xi1>, vector<16x512xf32>
    %113 = arith.addf %103, %112 : vector<16x512xf32>
    %114 = vector.broadcast %1 : vector<16x1xf32> to vector<16x512xf32>
    %115 = arith.addf %113, %114 : vector<16x512xf32>
    %116 = arith.negf %115 : vector<16x512xf32>
    %117 = math.exp %116 : vector<16x512xf32>
    %cst_26 = arith.constant 1.000000e+00 : f32
    %118 = vector.broadcast %cst_26 : f32 to vector<16x512xf32>
    %119 = arith.addf %118, %117 : vector<16x512xf32>
    %120 = arith.divf %118, %119 : vector<16x512xf32>
    %121 = arith.mulf %115, %120 : vector<16x512xf32>
    %c0_27 = arith.constant 0 : index
    %c0_28 = arith.constant 0 : index
    %122 = vector.load %arg4[%c0_27, %c0_28] : memref<4x16xf32, #tpu.memory_space<vmem>>, vector<4x16xf32>
    %c0_29 = arith.constant 0 : index
    %c0_30 = arith.constant 0 : index
    %123 = vector.load %arg5[%c0_29, %c0_30] : memref<16x4xf32, #tpu.memory_space<vmem>>, vector<16x4xf32>
    %c0_i32 = arith.constant 0 : i32
    %124 = vector.broadcast %c0_i32 : i32 to vector<1x512xi32>
    %125 = arith.cmpi eq, %25, %124 : vector<1x512xi32>
    %cst_31 = arith.constant 0.000000e+00 : f32
    %126 = vector.shape_cast %125 : vector<1x512xi1> to vector<1x512xi1>
    %127 = vector.broadcast %126 : vector<1x512xi1> to vector<16x512xi1>
    %128 = vector.broadcast %cst_31 : f32 to vector<16x512xf32>
    %129 = arith.select %127, %121, %128 : vector<16x512xi1>, vector<16x512xf32>
    %cst_32 = arith.constant dense<0.000000e+00> : vector<16xf32>
    %130 = vector.multi_reduction <add>, %129, %cst_32 [1] : vector<16x512xf32> to vector<16xf32>
    %131 = vector.shape_cast %130 : vector<16xf32> to vector<16x1xf32>
    %cst_33 = arith.constant 3.906250e-03 : f32
    %132 = vector.broadcast %cst_33 : f32 to vector<16x1xf32>
    %133 = arith.mulf %131, %132 : vector<16x1xf32>
    %cst_34 = arith.constant dense<0.000000e+00> : vector<4x1xf32>
    %134 = tpu.matmul %122, %133, %cst_34 {dimension_numbers = #tpu.dot_dimension_numbers<[1], [0], [0], [1], [0, 0, 1, 1], [], []>} : vector<4x16xf32>, vector<16x1xf32>, vector<4x1xf32> -> vector<4x1xf32>
    %135 = arith.addf %134, %2 : vector<4x1xf32>
    %136 = arith.negf %135 : vector<4x1xf32>
    %137 = math.exp %136 : vector<4x1xf32>
    %cst_35 = arith.constant 1.000000e+00 : f32
    %138 = vector.broadcast %cst_35 : f32 to vector<4x1xf32>
    %139 = arith.addf %138, %137 : vector<4x1xf32>
    %140 = arith.divf %138, %139 : vector<4x1xf32>
    %141 = arith.mulf %135, %140 : vector<4x1xf32>
    %cst_36 = arith.constant dense<0.000000e+00> : vector<16x1xf32>
    %142 = tpu.matmul %123, %141, %cst_36 {dimension_numbers = #tpu.dot_dimension_numbers<[1], [0], [0], [1], [0, 0, 1, 1], [], []>} : vector<16x4xf32>, vector<4x1xf32>, vector<16x1xf32> -> vector<16x1xf32>
    %143 = arith.addf %142, %3 : vector<16x1xf32>
    %144 = arith.negf %143 : vector<16x1xf32>
    %145 = math.exp %144 : vector<16x1xf32>
    %cst_37 = arith.constant 1.000000e+00 : f32
    %146 = vector.broadcast %cst_37 : f32 to vector<16x1xf32>
    %147 = arith.addf %146, %145 : vector<16x1xf32>
    %148 = arith.divf %146, %147 : vector<16x1xf32>
    %c1_i32_38 = arith.constant 1 : i32
    %149 = vector.broadcast %c1_i32_38 : i32 to vector<1x512xi32>
    %150 = arith.cmpi eq, %25, %149 : vector<1x512xi32>
    %cst_39 = arith.constant 0.000000e+00 : f32
    %151 = vector.shape_cast %150 : vector<1x512xi1> to vector<1x512xi1>
    %152 = vector.broadcast %151 : vector<1x512xi1> to vector<16x512xi1>
    %153 = vector.broadcast %cst_39 : f32 to vector<16x512xf32>
    %154 = arith.select %152, %121, %153 : vector<16x512xi1>, vector<16x512xf32>
    %cst_40 = arith.constant dense<0.000000e+00> : vector<16xf32>
    %155 = vector.multi_reduction <add>, %154, %cst_40 [1] : vector<16x512xf32> to vector<16xf32>
    %156 = vector.shape_cast %155 : vector<16xf32> to vector<16x1xf32>
    %cst_41 = arith.constant 3.906250e-03 : f32
    %157 = vector.broadcast %cst_41 : f32 to vector<16x1xf32>
    %158 = arith.mulf %156, %157 : vector<16x1xf32>
    %cst_42 = arith.constant dense<0.000000e+00> : vector<4x1xf32>
    %159 = tpu.matmul %122, %158, %cst_42 {dimension_numbers = #tpu.dot_dimension_numbers<[1], [0], [0], [1], [0, 0, 1, 1], [], []>} : vector<4x16xf32>, vector<16x1xf32>, vector<4x1xf32> -> vector<4x1xf32>
    %160 = arith.addf %159, %2 : vector<4x1xf32>
    %161 = arith.negf %160 : vector<4x1xf32>
    %162 = math.exp %161 : vector<4x1xf32>
    %cst_43 = arith.constant 1.000000e+00 : f32
    %163 = vector.broadcast %cst_43 : f32 to vector<4x1xf32>
    %164 = arith.addf %163, %162 : vector<4x1xf32>
    %165 = arith.divf %163, %164 : vector<4x1xf32>
    %166 = arith.mulf %160, %165 : vector<4x1xf32>
    %cst_44 = arith.constant dense<0.000000e+00> : vector<16x1xf32>
    %167 = tpu.matmul %123, %166, %cst_44 {dimension_numbers = #tpu.dot_dimension_numbers<[1], [0], [0], [1], [0, 0, 1, 1], [], []>} : vector<16x4xf32>, vector<4x1xf32>, vector<16x1xf32> -> vector<16x1xf32>
    %168 = arith.addf %167, %3 : vector<16x1xf32>
    %169 = arith.negf %168 : vector<16x1xf32>
    %170 = math.exp %169 : vector<16x1xf32>
    %cst_45 = arith.constant 1.000000e+00 : f32
    %171 = vector.broadcast %cst_45 : f32 to vector<16x1xf32>
    %172 = arith.addf %171, %170 : vector<16x1xf32>
    %173 = arith.divf %171, %172 : vector<16x1xf32>
    %174 = vector.shape_cast %150 : vector<1x512xi1> to vector<1x512xi1>
    %175 = vector.broadcast %174 : vector<1x512xi1> to vector<16x512xi1>
    %176 = vector.shape_cast %173 : vector<16x1xf32> to vector<16x1xf32>
    %177 = vector.broadcast %176 : vector<16x1xf32> to vector<16x512xf32>
    %178 = vector.shape_cast %148 : vector<16x1xf32> to vector<16x1xf32>
    %179 = vector.broadcast %178 : vector<16x1xf32> to vector<16x512xf32>
    %180 = arith.select %175, %177, %179 : vector<16x512xi1>, vector<16x512xf32>
    %181 = arith.mulf %121, %180 : vector<16x512xf32>
    %c0_46 = arith.constant 0 : index
    %c0_47 = arith.constant 0 : index
    %182 = vector.load %arg6[%c0_46, %c0_47] : memref<4x16xf32, #tpu.memory_space<vmem>>, vector<4x16xf32>
    %cst_48 = arith.constant dense<0.000000e+00> : vector<4x512xf32>
    %183 = tpu.matmul %182, %181, %cst_48 {dimension_numbers = #tpu.dot_dimension_numbers<[1], [0], [0], [1], [0, 0, 1, 1], [], []>} : vector<4x16xf32>, vector<16x512xf32>, vector<4x512xf32> -> vector<4x512xf32>
    %184 = vector.broadcast %4 : vector<4x1xf32> to vector<4x512xf32>
    %185 = arith.addf %183, %184 : vector<4x512xf32>
    %186 = arith.addf %185, %6 : vector<4x512xf32>
    %c0_49 = arith.constant 0 : index
    %c0_50 = arith.constant 0 : index
    %c0_51 = arith.constant 0 : index
    %187 = vector.load %arg8[%c0_49, %c0_50, %c0_51] : memref<1x4x512xf32, #tpu.memory_space<vmem>>, vector<1x4x512xf32>
    %188 = vector.shape_cast %187 : vector<1x4x512xf32> to vector<4x512xf32>
    %189 = vector.shape_cast %186 : vector<4x512xf32> to vector<1x4x512xf32>
    tpu.vector_store %arg8[%c0_49, %c0_50, %c0_51], %189 {strides = array<i32>} : memref<1x4x512xf32, #tpu.memory_space<vmem>>, vector<1x4x512xf32>,
    return
  }
  func.func @transform_0(%arg0: i32) -> (i32, i32, i32) {
    %c0_i32 = arith.constant 0 : i32
    %c0_i32_0 = arith.constant 0 : i32
    %c0_i32_1 = arith.constant 0 : i32
    return %arg0, %c0_i32, %c0_i32_0 : i32, i32, i32
  }
  func.func @transform_1(%arg0: i32) -> (i32, i32) {
    %c0_i32 = arith.constant 0 : i32
    %c0_i32_0 = arith.constant 0 : i32
    %c0_i32_1 = arith.constant 0 : i32
    return %c0_i32, %c0_i32_0 : i32, i32
  }
  func.func @transform_2(%arg0: i32) -> (i32, i32) {
    %c0_i32 = arith.constant 0 : i32
    %c0_i32_0 = arith.constant 0 : i32
    %c0_i32_1 = arith.constant 0 : i32
    return %c0_i32, %c0_i32_0 : i32, i32
  }
  func.func @transform_3(%arg0: i32) -> (i32, i32) {
    %c0_i32 = arith.constant 0 : i32
    %c0_i32_0 = arith.constant 0 : i32
    %c0_i32_1 = arith.constant 0 : i32
    return %c0_i32, %c0_i32_0 : i32, i32
  }
  func.func @transform_4(%arg0: i32) -> (i32, i32) {
    %c0_i32 = arith.constant 0 : i32
    %c0_i32_0 = arith.constant 0 : i32
    %c0_i32_1 = arith.constant 0 : i32
    return %c0_i32, %c0_i32_0 : i32, i32
  }
  func.func @transform_5(%arg0: i32) -> (i32, i32) {
    %c0_i32 = arith.constant 0 : i32
    %c0_i32_0 = arith.constant 0 : i32
    %c0_i32_1 = arith.constant 0 : i32
    return %c0_i32, %c0_i32_0 : i32, i32
  }
  func.func @transform_6(%arg0: i32) -> (i32, i32) {
    %c0_i32 = arith.constant 0 : i32
    %c0_i32_0 = arith.constant 0 : i32
    %c0_i32_1 = arith.constant 0 : i32
    return %c0_i32, %c0_i32_0 : i32, i32
  }
  func.func @transform_7(%arg0: i32) -> (i32, i32, i32) {
    %c0_i32 = arith.constant 0 : i32
    %c0_i32_0 = arith.constant 0 : i32
    %c0_i32_1 = arith.constant 0 : i32
    return %arg0, %c0_i32, %c0_i32_0 : i32, i32, i32
  }
}

</mosaic_0001>

<bundles_post_ra>
// kernel: tpu_custom_call.1
= control target key start
LH: loop header
LB: loop body
LE: loop exit
PB: predicated region body
PF: predicated region fallthrough
CT: control target
= control target key end

     0   :  { %vm3007_vm0 = vcmask 1043456   ;;  %v2991_v4 = vmov 0.0   ;;  %vm3010_vm1 = vcmask 31744   ;;  %v1798_v6 = vmov 2   ;;  %s2983_s0 = inlined_call_operand.vmem [shape: f32[1,4,512], index: 0, kind: input, shape index: {}]   ;;  %s2984_s1 = inlined_call_operand.vmem [shape: f32[16,4], index: 1, kind: input, shape index: {}]   ;;  %s2985_s2 = inlined_call_operand.vmem [shape: f32[16,9], index: 2, kind: input, shape index: {}]   ;;  %s2986_s3 = inlined_call_operand.vmem [shape: f32[4,16], index: 3, kind: input, shape index: {}]   ;;  %s2987_s4 = inlined_call_operand.vmem [shape: f32[16,4], index: 4, kind: input, shape index: {}]   ;;  %s2988_s5 = inlined_call_operand.vmem [shape: f32[4,16], index: 5, kind: input, shape index: {}]   ;;  %s2989_s6 = inlined_call_operand.vmem [shape: f32[64,1], index: 6, kind: input, shape index: {}]   ;;  %s2990_s7 = inlined_call_operand.hbm [shape: f32[1,4,512], index: 7, kind: output, shape index: {}]  }
   0x1   :  { %v35_v0 = vld [vmem:[%s2983_s0] sm:$0xff]  ;;  %v36_v1 = vld [vmem:[%s2983_s0 + $0x8] sm:$0xff]  ;;  %133 = vmatprep.mubr.f32.mxu0 %v2991_v4  ;;  %210 = vmatprep.mubr.f32.mxu1 %v2991_v4 }
   0x2   :  { %v1863_v2 = vcombine.high %v35_v0, %v35_v0  ;;  %v1865_v3 = vcombine.high %v36_v1, %v36_v1  ;;  %v37_v5 = vld [vmem:[%s2984_s1] sm:$0xff]  ;;  %1672 = vset.pattern.permute.xlu0 %v1798_v6 }
   0x4   :  { %3046 = vst [vmem:[#allocation5_spill] sm:$0xff] %v1863_v2  ;;  %3047 = vst [vmem:[#allocation6_spill] sm:$0xff] %v1865_v3  ;;  %1574 = vmatprep.subr.msk.mxu0 %vm3007_vm0, %v1863_v2  ;;  %1578 = vmatprep.subr.msk.mxu1 %vm3007_vm0, %v1865_v3 }
   0x5   :  { %12 = vsyncpa [#allocation3], 0  ;;  %1575 = vmatpush1.msk.msra.mxu0 %vm3007_vm0, %v35_v0  ;;  %1579 = vmatpush1.msk.msra.mxu1 %vm3007_vm0, %v36_v1  ;;  %v317_v7 = vld [vmem:[%s2985_s2 + $0x8] sm:$0xff]  ;;  %v1799_v9 = vmov 0   ;;  %v316_v10 = vld [vmem:[%s2985_s2] sm:$0xff]  ;;  %v1800_v11 = vmov 4  }
   0x6   :  { %1576 = vmatmul.mubr.msk.f32.vlgmr.msra.gmra.mxu0 %vm3010_vm1, %v37_v5  ;;  %1580 = vmatmul.mubr.msk.f32.vlgmr.msra.gmra.mxu1 %vm3010_vm1, %v37_v5  ;;  %v38_v8 = vld [vmem:[%s2984_s1 + $0x8] sm:$0xff]  ;;  %v1801_v12 = vmov 5   ;;  %v1802_v13 = vmov 7   ;;  %v1803_v14 = vmov 8   ;;  %v1804_v15 = vmov 1   ;;  %v27_v18 = vld [vmem:[%s2989_s6] sm:$0xff] }
   0x7   :  { %139 = vmatprep.mubr.f32.mxu0 %v2991_v4  ;;  %216 = vmatprep.mubr.f32.mxu1 %v2991_v4  ;;  %v28_v16 = vld [vmem:[%s2989_s6 + $0x8] sm:$0xff]  ;;  %v1805_v17 = vmov 3   ;;  %v1806_v19 = vmov 6   ;;  %v30_v20 = vld [vmem:[%s2989_s6 + $0x18] sm:$0xff]  ;;  %s1807_s17 = smov 17   ;;  %s1808_s18 = smov 16  }
   0x8   :  { %476 = vperm.xlu0 %1672, %v317_v7   ;;  %1670 = vset.pattern.permute.xlu1 %v1799_v9  ;;  %s1809_s19 = smov 15   ;;  %s1810_s20 = smov 1  }
   0x9   :  { %350 = vperm.xlu1 %1670, %v317_v7   ;;  %1626 = vmatprep.subr.mxu0 %v2991_v4  ;;  %s1811_s21 = smov 127   ;;  %s1812_s22 = smov 112  }
   0xa   :  { %1577 = vmatmul.mubr.msk.f32.gmra.mxu0 %vm3010_vm1, %v38_v8  ;;  %1581 = vmatmul.mubr.msk.f32.gmra.mxu1 %vm3010_vm1, %v38_v8  ;;  %s1813_s23 = smov 113   ;;  %s1814_s24 = smov 111  }
   0xb   :  { %s1816_s15 = smov [#allocation2]  }
   0xc   :  { %472 = vperm.xlu0 %1672, %v316_v10   ;;  %s1566_s16 = sshll.u32 %s1816_s15, 4  ;;  %s1567_s16 = int_to_ptr.vmem [resolvable:$true] %s1566_s16 }
   0xd   :  { %1671 = vset.pattern.permute.xlu1 %v1804_v15  ;;  %p1780_p1 = scmp.lt.s32.totalorder %s1567_s16, %s1567_s16 }
   0xe   :  { %411 = vperm.xlu1 %1671, %v317_v7  }
  0x10   :  { %1674 = vset.pattern.permute.xlu0 %v1800_v11 }
  0x11   :  { %585 = vperm.xlu0 %1674, %v317_v7  }
  0x12   :  { %407 = vperm.xlu1 %1671, %v316_v10  }
  0x15   :  { %581 = vperm.xlu0 %1674, %v316_v10  }
  0x16   :  { %1673 = vset.pattern.permute.xlu1 %v1805_v17 }
  0x17   :  { %545 = vperm.xlu1 %1673, %v317_v7  }
  0x19   :  { %1676 = vset.pattern.permute.xlu0 %v1801_v12 }
  0x1a   :  { %630 = vperm.xlu0 %1676, %v316_v10  }
  0x1b   :  { %541 = vperm.xlu1 %1673, %v316_v10  }
  0x1e   :  { %1678 = vset.pattern.permute.xlu0 %v1802_v13 }
  0x1f   :  { %768 = vperm.xlu0 %1678, %v317_v7   ;;  %1675 = vset.pattern.permute.xlu1 %v1801_v12 }
  0x20   :  { %634 = vperm.xlu1 %1675, %v317_v7  }
  0x23   :  { %1680 = vset.pattern.permute.xlu0 %v1803_v14 }
  0x24   :  { %833 = vperm.xlu0 %1680, %v317_v7   ;;  %1677 = vset.pattern.permute.xlu1 %v1806_v19 }
  0x25   :  { %699 = vperm.xlu1 %1677, %v317_v7  }
  0x28   :  { %829 = vperm.xlu0 %1680, %v316_v10  }
  0x29   :  { %695 = vperm.xlu1 %1677, %v316_v10  }
  0x2c   :  { %1681 = vset.pattern.permute.xlu0 %v1799_v9 }
  0x2d   :  { %46 = vperm.xlu0 %1681, %v28_v16   ;;  %1679 = vset.pattern.permute.xlu1 %v1802_v13 }
  0x2e   :  { %764 = vperm.xlu1 %1679, %v316_v10  }
  0x31   :  { %41 = vperm.xlu0 %1681, %v27_v18  }
  0x32   :  { %1682 = vset.pattern.permute.xlu1 %v1799_v9 }
  0x33   :  { %879 = vperm.xlu1 %1682, %v30_v20  }
  0x35   :  { %345 = vperm.xlu0 %1681, %v316_v10  }
  0x83   :  { %v1903_v21 = vpop.permute.xlu0 %476 }
  0x84   :  { %3048 = vst [vmem:[#allocation7_spill] sm:$0xff] %v1903_v21  ;;  %v1993_v18 = vpop.permute.xlu1 %350 }
  0x85   :  { %3053 = vst [vmem:[#allocation12_spill] sm:$0xff] %v1993_v18 }
  0x87   :  { %v1905_v22 = vpop.permute.xlu0 %472 }
  0x89   :  { %v2003_v19 = vpop.permute.xlu1 %411 }
  0x8a   :  { %3054 = vst [vmem:[#allocation13_spill] sm:$0xff] %v2003_v19 }
  0x8c   :  { %v1907_v23 = vpop.permute.xlu0 %585 }
  0x90   :  { %v1909_v24 = vpop.permute.xlu0 %581 }
  0x95   :  { %v1911_v25 = vpop.permute.xlu0 %630 }
  0x9a   :  { %v1913_v26 = vpop.permute.xlu0 %768 }
  0x9b   :  { %3049 = vst [vmem:[#allocation8_spill] sm:$0xff] %v1913_v26 }
  0x9f   :  { %v1915_v27 = vpop.permute.xlu0 %833 }
  0xa0   :  { %3050 = vst [vmem:[#allocation9_spill] sm:$0xff] %v1915_v27 }
  0xa3   :  { %v1917_v28 = vpop.permute.xlu0 %829 }
  0xa4   :  { %3051 = vst [vmem:[#allocation10_spill] sm:$0xff] %v1917_v28 }
  0xa8   :  { %v1919_v29 = vpop.permute.xlu0 %46 }
  0xac   :  { %v42_v30 = vpop.permute.xlu0 %41 }
  0xc6   :  { %v135_v31 = vpop.f32.mrf.mxu0  ;;  %v212_v32 = vpop.f32.mrf.mxu1 }
  0xc7   :  { %v136_v33 = vadd.f32 %v135_v31, %v42_v30  ;;  %v213_v34 = vadd.f32 %v212_v32, %v42_v30  ;;  %v2009_v31 = vpop.permute.xlu1 %407 }
  0xc8   :  { %v137_v37 = vpop.f32.mrf.mxu0  ;;  %v214_v43 = vpop.f32.mrf.mxu1 }
  0xc9   :  { %v1582_v35 = vmul.f32 -1.442695, %v136_v33  ;;  %v1584_v36 = vmul.f32 -1.442695, %v213_v34  ;;  %v138_v41 = vadd.f32 %v137_v37, %v42_v30  ;;  %v215_v45 = vadd.f32 %v214_v43, %v42_v30 }
  0xca   :  { %v218_v47 = vpop.f32.mrf.mxu1  ;;  %v141_v52 = vpop.f32.mrf.mxu0 }
  0xcb   :  { %1685 = vpow2.f32 %v1582_v35  ;;  %v1583_v44 = vmul.f32 -1.442695, %v138_v41  ;;  %v1585_v46 = vmul.f32 -1.442695, %v215_v45  ;;  %v219_v48 = vadd.f32 %v218_v47, %v1919_v29 }
  0xcc   :  { %1687 = vpow2.f32 %v1584_v36  ;;  %v142_v55 = vadd.f32 %v141_v52, %v1919_v29  ;;  %v220_v10 = vpop.f32.mrf.mxu1  ;;  %v143_v13 = vpop.f32.mrf.mxu0 }
  0xcd   :  { %v1588_v53 = vmul.f32 -1.442695, %v219_v48  ;;  %v221_v11 = vadd.f32 %v220_v10, %v1919_v29  ;;  %v144_v15 = vadd.f32 %v143_v13, %v1919_v29 }
  0xce   :  { %v1586_v57 = vmul.f32 -1.442695, %v142_v55 }
  0xcf   :  { %v1589_v16 = vmul.f32 -1.442695, %v221_v11  ;;  %v1587_v17 = vmul.f32 -1.442695, %v144_v15 }
  0xd8   :  { %v1686_v38 = vpop.eup %1685 }
  0xd9   :  { %v1688_v39 = vpop.eup %1687  ;;  %v247_v40 = vadd.f32 1.0, %v1686_v38 }
  0xda   :  { %v249_v42 = vadd.f32 1.0, %v1688_v39 }
  0xdb   :  { %1689 = vrcp.f32 %v247_v40 }
  0xdc   :  { %1691 = vrcp.f32 %v249_v42 }
  0xdd   :  { %1693 = vpow2.f32 %v1583_v44  ;;  %v2073_v44 = vpop.permute.xlu0 %345 }
  0xde   :  { %1695 = vpow2.f32 %v1585_v46 }
  0xdf   :  { %1697 = vpow2.f32 %v1588_v53 }
  0xe0   :  { %1699 = vpow2.f32 %v1586_v57 }
  0xe8   :  { %v1690_v49 = vpop.eup %1689 }
  0xe9   :  { %v1692_v50 = vpop.eup %1691  ;;  %v1922_v51 = vmul.f32 %v1690_v49, %v136_v33  ;;  %v2019_v33 = vpop.permute.xlu1 %545 }
  0xea   :  { %v1924_v54 = vmul.f32 %v1692_v50, %v213_v34  ;;  %v1694_v56 = vpop.eup %1693  ;;  %3055 = vst [vmem:[#allocation14_spill] sm:$0xff] %v2019_v33  ;;  %v3076_v33 = vmov 0 }
  0xeb   :  { %318 = vrot.lane.b32.xlu0 %v1922_v51, %s1807_s17  ;;  %v248_v58 = vadd.f32 1.0, %v1694_v56  ;;  %v1696_v59 = vpop.eup %1695 }
  0xec   :  { %326 = vrot.lane.b32.xlu1 %v1924_v54, %s1807_s17  ;;  %v250_v60 = vadd.f32 1.0, %v1696_v59  ;;  %v1698_v61 = vpop.eup %1697  ;;  %v279_v59 = vlaneseq }
  0xed   :  { %1701 = vrcp.f32 %v248_v58  ;;  %v253_v62 = vadd.f32 1.0, %v1698_v61  ;;  %v1700_v63 = vpop.eup %1699  ;;  %v2025_v34 = vpop.permute.xlu1 %541  ;;  %v29_v58 = vld [vmem:[%s2989_s6 + $0x10] sm:$0xff] }
  0xee   :  { %1703 = vrcp.f32 %v250_v60  ;;  %v251_v5 = vadd.f32 1.0, %v1700_v63 }
  0xef   :  { %381 = vrot.lane.b32.xlu0 %v1922_v51, %s1808_s18  ;;  %1705 = vrcp.f32 %v253_v62  ;;  %v2116_v62 = vand.u32 127, %v279_v59 }
  0xf0   :  { %389 = vrot.lane.b32.xlu1 %v1924_v54, %s1808_s18  ;;  %1707 = vrcp.f32 %v251_v5 }
  0xf1   :  { %1709 = vpow2.f32 %v1589_v16  ;;  %v2035_v36 = vpop.permute.xlu1 %634  ;;  %vm3017_vm2 = vcmp.lt.s32.totalorder %v2116_v62, 113  ;;  %vm3016_vm3 = vcmp.lt.s32.totalorder %v2116_v62, 112  ;;  %v2135_v10 = vadd.s32 128, %v2116_v62 }
  0xf2   :  { %1711 = vpow2.f32 %v1587_v17  ;;  %3056 = vst [vmem:[#allocation15_spill] sm:$0xff] %v2035_v36  ;;  %vm3014_vm4 = vcmp.lt.s32.totalorder %v2116_v62, 17  ;;  %v288_v3 = vshra.s32 %v2116_v62, 4  ;;  %vm3018_vm8 = vcmp.lt.s32.totalorder %v2116_v62, 16 }
  0xf3   :  { %446 = vrot.lane.b32.xlu0 %v1922_v51, %s1809_s19  ;;  %3061 = vst [vmem:[#allocation20_spill] sm:$0xff] %v2135_v10  ;;  %v289_v17 = vshra.s32 %v2135_v10, 4  ;;  %v285_v4 = vand.u32 15, %v2135_v10  ;;  %v284_v26 = vand.u32 15, %v2116_v62  ;;  %v3066_v36 = vmov 0 }
  0xf4   :  { %454 = vrot.lane.b32.xlu1 %v1924_v54, %s1809_s19 }
  0xf5   :  { %v2045_v40 = vpop.permute.xlu1 %699  ;;  %v2165_v59 = vand.u32 15, %v289_v17  ;;  %vm2193_vm9 = vcmp.ge.s32.totalorder %v285_v4, 1  ;;  %vm2231_vm15 = vcmp.ge.s32.totalorder %v284_v26, 1 }
  0xf6   :  { %3059 = vst [vmem:[#allocation18_spill] sm:$0xff] %v2045_v40  ;;  %v3067_v36 = vsel %vm2193_vm9, 4294967295, %v3066_v36  ;;  %v3077_v33 = vsel %vm2231_vm15, 4294967295, %v3076_v33 }
  0xf7   :  { %515 = vrot.lane.b32.xlu0 %v1922_v51, %s1810_s20  ;;  %vm3020_vm5 = vcmp.ge.s32.totalorder %v2165_v59, 1 }
  0xf8   :  { %523 = vrot.lane.b32.xlu1 %v1924_v54, %s1810_s20  ;;  %vm2205_vm10 = vmand %vm3020_vm5, %vm2193_vm9 }
  0xfa   :  { %v1702_v0 = vpop.eup %1701 }
  0xfb   :  { %612 = vrot.lane.b32.xlu0 %v1924_v54, %s1811_s21  ;;  %v1955_v1 = vmul.f32 %v1702_v0, %v138_v41  ;;  %v1704_v6 = vpop.eup %1703  ;;  %v2055_v41 = vpop.permute.xlu1 %695 }
  0xfc   :  { %604 = vrot.lane.b32.xlu1 %v1922_v51, %s1811_s21  ;;  %v1961_v7 = vmul.f32 %v1704_v6, %v215_v45  ;;  %v1706_v8 = vpop.eup %1705 }
  0xfd   :  { %v1971_v9 = vmul.f32 %v1706_v8, %v219_v48  ;;  %v1708_v12 = vpop.eup %1707 }
  0xfe   :  { %v1982_v14 = vmul.f32 %v1708_v12, %v142_v55  ;;  %v1710_v20 = vpop.eup %1709 }
  0xff   :  { %738 = vrot.lane.b32.xlu0 %v1922_v51, %s1812_s22  ;;  %3052 = vst [vmem:[#allocation11_spill] sm:$0xff] %v1971_v9  ;;  %v254_v29 = vadd.f32 1.0, %v1710_v20  ;;  %v1712_v30 = vpop.eup %1711  ;;  %v2061_v42 = vpop.permute.xlu1 %764 }
 0x100   :  { %669 = vrot.lane.b32.xlu1 %v1922_v51, %s1813_s23  ;;  %v252_v32 = vadd.f32 1.0, %v1712_v30  ;;  %v2158_v30 = vadd.s32 384, %v2116_v62 }
 0x101   :  { %1713 = vrcp.f32 %v254_v29 }
 0x102   :  { %1715 = vrcp.f32 %v252_v32  ;;  %3063 = vst [vmem:[#allocation22_spill] sm:$0xff] %v2158_v30 }
 0x103   :  { %746 = vrot.lane.b32.xlu0 %v1924_v54, %s1812_s22  ;;  %v2071_v43 = vpop.permute.xlu1 %879 }
 0x104   :  { %677 = vrot.lane.b32.xlu1 %v1924_v54, %s1813_s23  ;;  %3060 = vst [vmem:[#allocation19_spill] sm:$0xff] %v2071_v43 }
 0x107   :  { %673 = vrot.lane.b32.xlu0 %v1955_v1, %s1813_s23 }
 0x108   :  { %803 = vrot.lane.b32.xlu1 %v1922_v51, %s1814_s24 }
 0x10b   :  { %750 = vrot.lane.b32.xlu0 %v1961_v7, %s1812_s22 }
 0x10c   :  { %811 = vrot.lane.b32.xlu1 %v1924_v54, %s1814_s24 }
 0x10e   :  { %v1714_v35 = vpop.eup %1713 }
 0x10f   :  { %807 = vrot.lane.b32.xlu0 %v1955_v1, %s1814_s24  ;;  %v2037_v37 = vmul.f32 %v1714_v35, %v221_v11  ;;  %v1716_v38 = vpop.eup %1715  ;;  %v2138_v11 = vadd.s32 256, %v2116_v62 }
 0x110   :  { %322 = vrot.lane.b32.xlu1 %v1955_v1, %s1807_s17  ;;  %v2043_v39 = vmul.f32 %v1716_v38, %v144_v15 }
 0x111   :  { %3057 = vst [vmem:[#allocation16_spill] sm:$0xff] %v2037_v37  ;;  %3062 = vst [vmem:[#allocation21_spill] sm:$0xff] %v2138_v11  ;;  %v290_v20 = vshra.s32 %v2138_v11, 4  ;;  %v286_v35 = vand.u32 15, %v2138_v11  ;;  %v291_v11 = vshra.s32 %v2158_v30, 4 }
 0x112   :  { %3058 = vst [vmem:[#allocation17_spill] sm:$0xff] %v2043_v39 }
 0x113   :  { %328 = vrot.lane.b32.xlu0 %v1971_v9, %s1807_s17  ;;  %v2171_v2 = vand.u32 15, %v290_v20  ;;  %vm2178_vm7 = vcmp.ge.s32.totalorder %v286_v35, 1  ;;  %v2199_v40 = vand.u32 15, %v291_v11 }
 0x114   :  { %330 = vrot.lane.b32.xlu1 %v1961_v7, %s1807_s17 }
 0x115   :  { %vm3022_vm6 = vcmp.ge.s32.totalorder %v2171_v2, 1  ;;  %vm3019_vm13 = vcmp.ge.s32.totalorder %v2199_v40, 1 }
 0x116   :  { %vm2213_vm11 = vmand %vm3022_vm6, %vm2178_vm7 }
 0x117   :  { %391 = vrot.lane.b32.xlu0 %v1971_v9, %s1808_s18 }
 0x118   :  { %385 = vrot.lane.b32.xlu1 %v1955_v1, %s1808_s18 }
 0x11b   :  { %448 = vrot.lane.b32.xlu0 %v1982_v14, %s1809_s19 }
 0x11c   :  { %393 = vrot.lane.b32.xlu1 %v1961_v7, %s1808_s18 }
 0x11f   :  { %456 = vrot.lane.b32.xlu0 %v1971_v9, %s1809_s19 }
 0x120   :  { %450 = vrot.lane.b32.xlu1 %v1955_v1, %s1809_s19 }
 0x123   :  { %517 = vrot.lane.b32.xlu0 %v1982_v14, %s1810_s20 }
 0x124   :  { %458 = vrot.lane.b32.xlu1 %v1961_v7, %s1809_s19 }
 0x127   :  { %525 = vrot.lane.b32.xlu0 %v1971_v9, %s1810_s20 }
 0x128   :  { %519 = vrot.lane.b32.xlu1 %v1955_v1, %s1810_s20 }
 0x12b   :  { %606 = vrot.lane.b32.xlu0 %v1982_v14, %s1811_s21 }
 0x12c   :  { %527 = vrot.lane.b32.xlu1 %v1961_v7, %s1810_s20 }
 0x12f   :  { %614 = vrot.lane.b32.xlu0 %v1971_v9, %s1811_s21 }
 0x130   :  { %608 = vrot.lane.b32.xlu1 %v1955_v1, %s1811_s21 }
 0x133   :  { %671 = vrot.lane.b32.xlu0 %v1982_v14, %s1813_s23 }
 0x134   :  { %616 = vrot.lane.b32.xlu1 %v1961_v7, %s1811_s21 }
 0x137   :  { %679 = vrot.lane.b32.xlu0 %v1971_v9, %s1813_s23 }
 0x138   :  { %681 = vrot.lane.b32.xlu1 %v1961_v7, %s1813_s23 }
 0x13b   :  { %805 = vrot.lane.b32.xlu0 %v1982_v14, %s1814_s24 }
 0x13c   :  { %742 = vrot.lane.b32.xlu1 %v1955_v1, %s1812_s22 }
 0x13f   :  { %813 = vrot.lane.b32.xlu0 %v1971_v9, %s1814_s24 }
 0x140   :  { %320 = vrot.lane.b32.xlu1 %v1982_v14, %s1807_s17 }
 0x143   :  { %332 = vrot.lane.b32.xlu0 %v2037_v37, %s1807_s17 }
 0x144   :  { %383 = vrot.lane.b32.xlu1 %v1982_v14, %s1808_s18 }
 0x147   :  { %387 = vrot.lane.b32.xlu0 %v2043_v39, %s1808_s18 }
 0x148   :  { %740 = vrot.lane.b32.xlu1 %v1982_v14, %s1812_s22 }
 0x14b   :  { %460 = vrot.lane.b32.xlu0 %v2037_v37, %s1809_s19 }
 0x14c   :  { %748 = vrot.lane.b32.xlu1 %v1971_v9, %s1812_s22 }
 0x14f   :  { %529 = vrot.lane.b32.xlu0 %v2037_v37, %s1810_s20 }
 0x150   :  { %324 = vrot.lane.b32.xlu1 %v2043_v39, %s1807_s17 }
 0x153   :  { %683 = vrot.lane.b32.xlu0 %v2037_v37, %s1813_s23 }
 0x154   :  { %395 = vrot.lane.b32.xlu1 %v2037_v37, %s1808_s18 }
 0x157   :  { %744 = vrot.lane.b32.xlu0 %v2043_v39, %s1812_s22 }
 0x158   :  { %452 = vrot.lane.b32.xlu1 %v2043_v39, %s1809_s19 }
 0x15b   :  { %817 = vrot.lane.b32.xlu0 %v2037_v37, %s1814_s24 }
 0x15c   :  { %521 = vrot.lane.b32.xlu1 %v2043_v39, %s1810_s20  ;;  %s1775_s20 = scalar_lea.vmem %s1567_s16, 256 }
 0x15d   :  { %v319_v45 = vpop.permute.xlu0 %318  ;;  %p1776_p0 = scmp.ne.s32.totalorder %s1567_s16, %s1775_s20  ;;  %p1781_p2 = scmp.lt.s32.totalorder %s1775_s20, %s1775_s20 }
 0x15e   :  { %v327_v46 = vpop.permute.xlu1 %326 }
 0x15f   :  { %815 = vrot.lane.b32.xlu0 %v1961_v7, %s1814_s24  ;;  %p1782_p3 = por %p1781_p2, %p1780_p1 }
 0x160   :  { %610 = vrot.lane.b32.xlu1 %v2043_v39, %s1811_s21 }
 0x161   :  { %v2083_v47 = vpop.permute.xlu0 %381  ;;  %p1783_p4 = pnand %p1782_p3, %p1776_p0 }
 0x162   :  { %v2085_v48 = vpop.permute.xlu1 %389 }
 0x164   :  { %618 = vrot.lane.b32.xlu1 %v2037_v37, %s1811_s21 }
 0x165   :  { %v2089_v49 = vpop.permute.xlu0 %446 }
 0x166   :  { %v2091_v50 = vpop.permute.xlu1 %454 }
 0x168   :  { %675 = vrot.lane.b32.xlu1 %v2043_v39, %s1813_s23 }
 0x169   :  { %v2095_v52 = vpop.permute.xlu0 %515 }
 0x16a   :  { %v2097_v53 = vpop.permute.xlu1 %523 }
 0x16c   :  { %752 = vrot.lane.b32.xlu1 %v2037_v37, %s1812_s22  ;;  %v2191_v37 = vand.u32 15, %v288_v3  ;;  %v3071_v3 = vmov 0 }
 0x16d   :  { %v2101_v55 = vpop.permute.xlu0 %612  ;;  %v3072_v3 = vsel %vm2213_vm11, 4294967295, %v3071_v3 }
 0x16e   :  { %v2103_v56 = vpop.permute.xlu1 %604  ;;  %3073 = vst [vmem:[#allocation24_spill] sm:$0xff] %v3072_v3  ;;  %vm3021_vm12 = vcmp.ge.s32.totalorder %v2191_v37, 1 }
 0x16f   :  { %vm2245_vm0 = vmand %vm3021_vm12, %vm2231_vm15 }
 0x170   :  { %809 = vrot.lane.b32.xlu1 %v2043_v39, %s1814_s24 }
 0x171   :  { %v2107_v57 = vpop.permute.xlu0 %738 }
 0x172   :  { %v2112_v60 = vpop.permute.xlu1 %669 }
 0x174   :  { %874 = vperm.xlu1 %1682, %v29_v58  }
 0x175   :  { %v2114_v61 = vpop.permute.xlu0 %746 }
 0x176   :  { %v2118_v63 = vpop.permute.xlu1 %677 }
 0x179   :  { %v674_v0 = vpop.permute.xlu0 %673 }
 0x17a   :  { %v2121_v5 = vpop.permute.xlu1 %803  ;;  %v2126_v6 = vsel %vm3017_vm2, %v674_v0, %v2118_v63  ;;  %v2131_v8 = vsel %vm3017_vm2, %v2112_v60, %v674_v0  ;;  %vm2274_vm2 = vcmp.le.s32.totalorder %v285_v4, 14  ;;  %v3088_v4 = vmov 0 }
 0x17d   :  { %v751_v12 = vpop.permute.xlu0 %750 }
 0x17e   :  { %v2140_v13 = vpop.permute.xlu1 %811  ;;  %v2145_v15 = vsel %vm3016_vm3, %v2114_v61, %v751_v12  ;;  %v2150_v16 = vsel %vm3016_vm3, %v751_v12, %v2107_v57 }
 0x181   :  { %v2155_v29 = vpop.permute.xlu0 %807 }
 0x182   :  { %v323_v32 = vpop.permute.xlu1 %322 }
 0x183   :  { %v337_v38 = vsel %vm3014_vm4, %v323_v32, %v327_v46  ;;  %v339_v58 = vsel %vm3014_vm4, %v319_v45, %v323_v32 }
 0x184   :  { %v354_v0 = vmul.f32 %v2073_v44, %v339_v58  ;;  %v355_v12 = vmul.f32 %v2073_v44, %v337_v38  ;;  %v287_v38 = vand.u32 15, %v2158_v30 }
 0x185   :  { %v2173_v43 = vpop.permute.xlu0 %328 }
 0x186   :  { %v331_v27 = vpop.permute.xlu1 %330  ;;  %vm2225_vm14 = vcmp.ge.s32.totalorder %v287_v38, 1  ;;  %v374_v21 = vsel %vm2205_vm10, %v354_v0, 0.0  ;;  %v3081_v0 = vmov 0 }
 0x187   :  { %v335_v32 = vsel %vm3014_vm4, %v327_v46, %v331_v27  ;;  %v341_v20 = vsel %vm3014_vm4, %v331_v27, %v319_v45  ;;  %v3068_v27 = vmov 0  ;;  %vm2257_vm1 = vmand %vm3019_vm13, %vm2225_vm14  ;;  %vm2269_vm4 = vcmp.le.s32.totalorder %v286_v35, 14 }
 0x188   :  { %v353_v58 = vmul.f32 %v2073_v44, %v341_v20  ;;  %v356_v10 = vmul.f32 %v2073_v44, %v335_v32  ;;  %v3069_v27 = vsel %vm2205_vm10, 4294967295, %v3068_v27  ;;  %v3082_v0 = vsel %vm2257_vm1, 4294967295, %v3081_v0  ;;  %vm2300_vm3 = vmand %vm3022_vm6, %vm2269_vm4 }
 0x189   :  { %v2197_v46 = vpop.permute.xlu0 %391  ;;  %3070 = vst [vmem:[#allocation23_spill] sm:$0xff] %v3069_v27  ;;  %3083 = vst [vmem:[#allocation26_spill] sm:$0xff] %v3082_v0 }
 0x18a   :  { %v386_v44 = vpop.permute.xlu1 %385 }
 0x18b   :  { %v400_v45 = vsel %vm3018_vm8, %v386_v44, %v2085_v48  ;;  %v402_v11 = vsel %vm3018_vm8, %v2083_v47, %v386_v44  ;;  %v375_v44 = vsel %vm2213_vm11, %v355_v12, 0.0  ;;  %vm3103_vm11 = vcmp.ge.s32.totalorder %v2199_v40, 1 }
 0x18c   :  { %v415_v20 = vmul.f32 %v2009_v31, %v402_v11  ;;  %v416_v30 = vmul.f32 %v2009_v31, %v400_v45 }
 0x18d   :  { %v2235_v39 = vpop.permute.xlu0 %448 }
 0x18e   :  { %3078 = vst [vmem:[#allocation25_spill] sm:$0xff] %v2235_v39  ;;  %v431_v45 = vsel %vm3020_vm5, %v415_v20, 0.0  ;;  %v432_v9 = vsel %vm3022_vm6, %v416_v30, 0.0  ;;  %v394_v19 = vpop.permute.xlu1 %393  ;;  %vm2316_vm6 = vcmp.le.s32.totalorder %v284_v26, 14 }
 0x18f   :  { %v439_v12 = vadd.f32 %v431_v45, %v374_v21  ;;  %v440_v3 = vadd.f32 %v432_v9, %v375_v44  ;;  %v398_v27 = vsel %vm3018_vm8, %v2085_v48, %v394_v19  ;;  %v404_v20 = vsel %vm3018_vm8, %v394_v19, %v2083_v47  ;;  %vm2292_vm8 = vmand %vm3020_vm5, %vm2274_vm2 }
 0x190   :  { %v414_v30 = vmul.f32 %v2009_v31, %v404_v20  ;;  %v417_v18 = vmul.f32 %v2009_v31, %v398_v27  ;;  %v373_v48 = vsel %vm2245_vm0, %v353_v58, 0.0  ;;  %v376_v19 = vsel %vm2257_vm1, %v356_v10, 0.0 }
 0x191   :  { %v2278_v9 = vpop.permute.xlu0 %456  ;;  %v3089_v4 = vsel %vm2292_vm8, 4294967295, %v3088_v4  ;;  %v3091_v10 = vmov 0 }
 0x192   :  { %v430_v31 = vsel %vm3021_vm12, %v414_v30, 0.0  ;;  %v433_v47 = vsel %vm3019_vm13, %v417_v18, 0.0  ;;  %3090 = vst [vmem:[#allocation27_spill] sm:$0xff] %v3089_v4  ;;  %v451_v35 = vpop.permute.xlu1 %450  ;;  %v3092_v10 = vsel %vm2300_vm3, 4294967295, %v3091_v10  ;;  %vm3094_vm13 = vcmp.lt.s32.totalorder %v2116_v62, 15 }
 0x193   :  { %v438_v27 = vadd.f32 %v430_v31, %v373_v48  ;;  %v441_v58 = vadd.f32 %v433_v47, %v376_v19  ;;  %3093 = vst [vmem:[#allocation28_spill] sm:$0xff] %v3092_v10  ;;  %v465_v18 = vsel %vm3094_vm13, %v451_v35, %v2091_v50  ;;  %vm3095_vm5 = vmmov %vm3094_vm13  ;;  %vm2312_vm12 = vcmp.le.s32.totalorder %v287_v38, 14 }
 0x194   :  { %v467_v44 = vsel %vm3095_vm5, %v2089_v49, %v451_v35  ;;  %v481_v20 = vmul.f32 %v1905_v22, %v465_v18  ;;  %vm3100_vm5 = vcmp.ge.s32.totalorder %v2191_v37, 1  ;;  %vm2338_vm10 = vmand %vm3103_vm11, %vm2312_vm12  ;;  %vm3032_vm11 = vcmp.le.s32.totalorder %v2191_v37, 14 }
 0x195   :  { %v480_v45 = vmul.f32 %v1905_v22, %v467_v44  ;;  %v2320_v19 = vpop.permute.xlu0 %517  ;;  %vm2330_vm13 = vmand %vm3100_vm5, %vm2316_vm6 }
 0x196   :  { %v501_v47 = vsel %vm2300_vm3, %v481_v20, 0.0  ;;  %v459_v26 = vpop.permute.xlu1 %458  ;;  %vm3106_vm3 = vcmp.lt.s32.totalorder %v2116_v62, 15 }
 0x197   :  { %v500_v31 = vsel %vm2292_vm8, %v480_v45, 0.0  ;;  %v509_v18 = vadd.f32 %v501_v47, %v440_v3  ;;  %v463_v45 = vsel %vm3106_vm3, %v2091_v50, %v459_v26  ;;  %vm3107_vm5 = vmmov %vm3106_vm3  ;;  %vm3030_vm8 = vcmp.lt.s32.totalorder %v2116_v62, 1 }
 0x198   :  { %v508_v35 = vadd.f32 %v500_v31, %v439_v12  ;;  %v469_v20 = vsel %vm3107_vm5, %v459_v26, %v2089_v49  ;;  %v482_v3 = vmul.f32 %v1905_v22, %v463_v45  ;;  %vm3031_vm3 = vcmp.lt.s32.totalorder %v2116_v62, 127 }
 0x199   :  { %v479_v10 = vmul.f32 %v1905_v22, %v469_v20  ;;  %v2351_v12 = vpop.permute.xlu0 %525  ;;  %vm3034_vm5 = vcmp.le.s32.totalorder %v2165_v59, 14 }
 0x19a   :  { %v502_v47 = vsel %vm2338_vm10, %v482_v3, 0.0  ;;  %v520_v4 = vpop.permute.xlu1 %519  ;;  %v590_v3 = vmul.f32 %v1909_v24, %v1924_v54  ;;  %v588_v54 = vmul.f32 %v1909_v24, %v1922_v51 }
 0x19b   :  { %v499_v31 = vsel %vm2330_vm13, %v479_v10, 0.0  ;;  %v510_v0 = vadd.f32 %v502_v47, %v441_v58  ;;  %v534_v49 = vsel %vm3030_vm8, %v520_v4, %v2097_v53  ;;  %v536_v22 = vsel %vm3030_vm8, %v2095_v52, %v520_v4 }
 0x19c   :  { %v507_v50 = vadd.f32 %v499_v31, %v438_v27  ;;  %v549_v26 = vmul.f32 %v2025_v34, %v536_v22  ;;  %v550_v45 = vmul.f32 %v2025_v34, %v534_v49 }
 0x19d   :  { %v2365_v20 = vpop.permute.xlu0 %606 }
 0x19e   :  { %v565_v10 = vsel %vm2193_vm9, %v549_v26, 0.0  ;;  %v566_v27 = vsel %vm2178_vm7, %v550_v45, 0.0  ;;  %v528_v58 = vpop.permute.xlu1 %527 }
 0x19f   :  { %v573_v31 = vadd.f32 %v565_v10, %v508_v35  ;;  %v574_v47 = vadd.f32 %v566_v27, %v509_v18  ;;  %v532_v4 = vsel %vm3030_vm8, %v2097_v53, %v528_v58  ;;  %v538_v49 = vsel %vm3030_vm8, %v528_v58, %v2095_v52  ;;  %vm2404_vm8 = vmand %vm3032_vm11, %vm2231_vm15 }
 0x1a0   :  { %v548_v22 = vmul.f32 %v2025_v34, %v538_v49  ;;  %v551_v26 = vmul.f32 %v2025_v34, %v532_v4  ;;  %v589_v34 = vmul.f32 %v1909_v24, %v1955_v1  ;;  %v702_v1 = vmul.f32 %v2055_v41, %v2131_v8 }
 0x1a1   :  { %v2385_v35 = vpop.permute.xlu0 %614  ;;  %v598_v18 = vadd.f32 %v590_v3, %v574_v47  ;;  %v3108_v3 = vmov 0  ;;  %v3110_v4 = vmov 0  ;;  %v591_v8 = vmul.f32 %v1909_v24, %v1961_v7 }
 0x1a2   :  { %v564_v53 = vsel %vm2231_vm15, %v548_v22, 0.0  ;;  %v567_v52 = vsel %vm2225_vm14, %v551_v26, 0.0  ;;  %v609_v45 = vpop.permute.xlu1 %608  ;;  %v3109_v3 = vsel %vm2404_vm8, 4294967295, %v3108_v3  ;;  %v597_v22 = vadd.f32 %v589_v34, %v573_v31 }
 0x1a3   :  { %v572_v10 = vadd.f32 %v564_v53, %v507_v50  ;;  %v575_v27 = vadd.f32 %v567_v52, %v510_v0  ;;  %v623_v51 = vsel %vm3031_vm3, %v609_v45, %v2101_v55  ;;  %v625_v58 = vsel %vm3031_vm3, %v2103_v56, %v609_v45  ;;  %vm2418_vm3 = vmand %vm3034_vm5, %vm2193_vm9 }
 0x1a4   :  { %v703_v0 = vmul.f32 %v2055_v41, %v2126_v6  ;;  %v637_v50 = vmul.f32 %v1911_v25, %v625_v58  ;;  %v638_v47 = vmul.f32 %v1911_v25, %v623_v51  ;;  %v3111_v4 = vsel %vm2418_vm3, 4294967295, %v3110_v4 }
 0x1a5   :  { %v596_v49 = vadd.f32 %v588_v54, %v572_v10  ;;  %v2424_v26 = vpop.permute.xlu0 %671  ;;  %vm3037_vm11 = vcmp.le.s32.totalorder %v2171_v2, 14  ;;  %vm3112_vm5 = vcmp.lt.s32.totalorder %v2116_v62, 127  ;;  %v722_v7 = vsel %vm2404_vm8, %v702_v1, 0.0 }
 0x1a6   :  { %v653_v6 = vsel %vm2316_vm6, %v637_v50, 0.0  ;;  %v654_v53 = vsel %vm2274_vm2, %v638_v47, 0.0  ;;  %v617_v52 = vpop.permute.xlu1 %616  ;;  %vm3113_vm9 = vmmov %vm3112_vm5  ;;  %v723_v54 = vsel %vm2418_vm3, %v703_v0, 0.0  ;;  %v599_v58 = vadd.f32 %v591_v8, %v575_v27 }
 0x1a7   :  { %v661_v45 = vadd.f32 %v653_v6, %v596_v49  ;;  %v662_v51 = vadd.f32 %v654_v53, %v597_v22  ;;  %v621_v31 = vsel %vm3112_vm5, %v2101_v55, %v617_v52  ;;  %v627_v24 = vsel %vm3113_vm9, %v617_v52, %v2103_v56  ;;  %vm2459_vm9 = vmand %vm3037_vm11, %vm2178_vm7 }
 0x1a8   :  { %v639_v34 = vmul.f32 %v1911_v25, %v621_v31  ;;  %v640_v10 = vmul.f32 %v1911_v25, %v627_v24  ;;  %v773_v56 = vmul.f32 %v2061_v42, %v2145_v15  ;;  %v774_v1 = vmul.f32 %v2061_v42, %v2150_v16 }
 0x1a9   :  { %v2445_v50 = vpop.permute.xlu0 %679  ;;  %v730_v55 = vadd.f32 %v722_v7, %v661_v45  ;;  %v731_v47 = vadd.f32 %v723_v54, %v662_v51  ;;  %vm3116_vm5 = vcmp.le.s32.totalorder %v2199_v40, 14  ;;  %v3117_v16 = vmov 0 }
 0x1aa   :  { %v655_v0 = vsel %vm2269_vm4, %v639_v34, 0.0  ;;  %v656_v49 = vsel %vm2312_vm12, %v640_v10, 0.0  ;;  %v682_v27 = vpop.permute.xlu1 %681  ;;  %vm2467_vm15 = vmand %vm3116_vm5, %vm2225_vm14  ;;  %vm3119_vm3 = vcmp.lt.s32.totalorder %v2116_v62, 113  ;;  %vm3121_vm8 = vcmp.lt.s32.totalorder %v2116_v62, 111 }
 0x1ab   :  { %v663_v22 = vadd.f32 %v655_v0, %v598_v18  ;;  %v664_v15 = vadd.f32 %v656_v49, %v599_v58  ;;  %v3118_v16 = vsel %vm2467_vm15, 4294967295, %v3117_v16  ;;  %v686_v8 = vsel %vm3119_vm3, %v2118_v63, %v682_v27  ;;  %vm3120_vm11 = vmmov %vm3119_vm3 }
 0x1ac   :  { %v692_v6 = vsel %vm3120_vm11, %v682_v27, %v2112_v60  ;;  %v704_v53 = vmul.f32 %v2055_v41, %v686_v8  ;;  %v822_v52 = vsel %vm3121_vm8, %v2155_v29, %v2140_v13  ;;  %vm3122_vm5 = vmmov %vm3121_vm8  ;;  %vm3123_vm3 = vcmp.le.s32.totalorder %v2171_v2, 14 }
 0x1ad   :  { %v705_v18 = vmul.f32 %v2055_v41, %v692_v6  ;;  %v824_v45 = vsel %vm3122_vm5, %v2121_v5, %v2155_v29  ;;  %v2487_v51 = vpop.permute.xlu0 %805  ;;  %v789_v63 = vsel %vm3123_vm3, %v773_v56, 0.0  ;;  %vm3124_vm11 = vcmp.le.s32.totalorder %v2199_v40, 14 }
 0x1ae   :  { %v790_v60 = vsel %vm3124_vm11, %v774_v1, 0.0  ;;  %v724_v41 = vsel %vm2459_vm9, %v704_v53, 0.0  ;;  %v743_v24 = vpop.permute.xlu1 %742  ;;  %vm3125_vm8 = vcmp.lt.s32.totalorder %v2116_v62, 112  ;;  %vm3127_vm3 = vcmp.le.s32.totalorder %v2191_v37, 14 }
 0x1af   :  { %v725_v31 = vsel %vm2467_vm15, %v705_v18, 0.0  ;;  %v732_v7 = vadd.f32 %v724_v41, %v663_v22  ;;  %v757_v29 = vsel %vm3125_vm8, %v743_v24, %v2114_v61  ;;  %vm3126_vm5 = vmmov %vm3125_vm8  ;;  %v3128_v10 = vmov 0 }
 0x1b0   :  { %v733_v54 = vadd.f32 %v725_v31, %v664_v15  ;;  %v759_v34 = vsel %vm3126_vm5, %v2107_v57, %v743_v24  ;;  %vm2507_vm11 = vmand %vm3127_vm3, %vm2316_vm6  ;;  %v836_v58 = vmul.f32 %v1917_v28, %v824_v45  ;;  %v837_v56 = vmul.f32 %v1917_v28, %v822_v52 }
 0x1b1   :  { %v3129_v10 = vsel %vm2507_vm11, 4294967295, %v3128_v10  ;;  %v771_v1 = vmul.f32 %v2061_v42, %v759_v34  ;;  %v772_v61 = vmul.f32 %v2061_v42, %v757_v29  ;;  %vm3131_vm8 = vcmp.le.s32.totalorder %v2165_v59, 14  ;;  %v2523_v0 = vpop.permute.xlu0 %813 }
 0x1b2   :  { %3130 = vst [vmem:[#allocation29_spill] sm:$0xff] %v3129_v10  ;;  %vm2519_vm5 = vmand %vm3131_vm8, %vm2274_vm2  ;;  %v3132_v57 = vmov 0  ;;  %v2525_v49 = vadd.f32 %v789_v63, %v732_v7  ;;  %v2527_v27 = vadd.f32 %v790_v60, %v733_v54  ;;  %v321_v15 = vpop.permute.xlu1 %320  ;;  %v856_v53 = vsel %vm2507_vm11, %v836_v58, 0.0  ;;  %v3167_v10 = vld [vmem:[#allocation24_spill] sm:$0xff] }
 0x1b3   :  { %v3133_v57 = vsel %vm2519_vm5, 4294967295, %v3132_v57  ;;  %v787_v22 = vsel %vm3127_vm3, %v771_v1, 0.0  ;;  %vm3137_vm15 = vmmov %vm3131_vm8  ;;  %v857_v18 = vsel %vm2519_vm5, %v837_v56, 0.0  ;;  %vm3142_vm3 = vcmp.lt.s32.totalorder %v2116_v62, 16 }
 0x1b4   :  { %3134 = vst [vmem:[#allocation30_spill] sm:$0xff] %v3133_v57  ;;  %3135 = vst [vmem:[#allocation31_spill] sm:$0xff] %v2525_v49  ;;  %v788_v42 = vsel %vm3137_vm15, %v772_v61, 0.0  ;;  %v795_v8 = vadd.f32 %v787_v22, %v730_v55  ;;  %vm3140_vm15 = vcmp.lt.s32.totalorder %v2116_v62, 17  ;;  %v2557_v1 = vmul.f32 %v1907_v23, %v1982_v14  ;;  %v3145_v22 = vld [vmem:[#allocation25_spill] sm:$0xff] }
 0x1b5   :  { %3136 = vst [vmem:[#allocation32_spill] sm:$0xff] %v2527_v27  ;;  %v796_v6 = vadd.f32 %v788_v42, %v731_v47  ;;  %v333_v52 = vpop.permute.xlu0 %332  ;;  %vm3141_vm8 = vmmov %vm3140_vm15  ;;  %vm3144_vm11 = vcmp.lt.s32.totalorder %v2116_v62, 15 }
 0x1b6   :  { %v2537_v45 = vadd.f32 %v856_v53, %v795_v8  ;;  %v384_v60 = vpop.permute.xlu1 %383  ;;  %v342_v54 = vsel %vm3140_vm15, %v333_v52, %v321_v15  ;;  %v336_v29 = vsel %vm3141_vm8, %v2173_v43, %v333_v52  ;;  %vm3143_vm5 = vmmov %vm3142_vm3  ;;  %v3148_v53 = vld [vmem:[#allocation12_spill] sm:$0xff]  ;;  %v3150_v52 = vld [vmem:[#allocation13_spill] sm:$0xff] }
 0x1b7   :  { %v2539_v63 = vadd.f32 %v857_v18, %v796_v6  ;;  %vm3146_vm15 = vmmov %vm3144_vm11  ;;  %v357_v18 = vmul.f32 %v3148_v53, %v342_v54  ;;  %v3153_v54 = vld [vmem:[#allocation7_spill] sm:$0xff] }
 0x1b8   :  { %3138 = vst [vmem:[#allocation33_spill] sm:$0xff] %v2537_v45  ;;  %vm3147_vm8 = vmmov %vm3142_vm3 }
 0x1b9   :  { %3139 = vst [vmem:[#allocation34_spill] sm:$0xff] %v2539_v63  ;;  %v388_v41 = vpop.permute.xlu0 %387  ;;  %v3151_v63 = vld [vmem:[#allocation11_spill] sm:$0xff] }
 0x1ba   :  { %v2541_v31 = vpop.permute.xlu1 %740  ;;  %v401_v34 = vsel %vm3142_vm3, %v388_v41, %v2197_v46  ;;  %v403_v58 = vsel %vm3143_vm5, %v384_v60, %v388_v41  ;;  %vm3149_vm5 = vcmp.lt.s32.totalorder %v2116_v62, 17  ;;  %v2576_v45 = vmul.f32 %v1907_v23, %v3151_v63 }
 0x1bb   :  { %v419_v27 = vmul.f32 %v3150_v52, %v403_v58 }
 0x1bd   :  { %v461_v7 = vpop.permute.xlu0 %460 }
 0x1be   :  { %v2543_v24 = vpop.permute.xlu1 %748  ;;  %v464_v61 = vsel %vm3144_vm11, %v2278_v9, %v461_v7  ;;  %v470_v42 = vsel %vm3146_vm15, %v461_v7, %v3145_v22  ;;  %v360_v7 = vmul.f32 %v3148_v53, %v336_v29  ;;  %vm3152_vm11 = vmmov %vm3149_vm5  ;;  %vm3154_vm15 = vcmp.lt.s32.totalorder %v2116_v62, 1 }
 0x1c0   :  { %v380_v57 = vsel %vm2257_vm1, %v360_v7, 0.0 }
 0x1c1   :  { %v530_v47 = vpop.permute.xlu0 %529 }
 0x1c2   :  { %v325_v55 = vpop.permute.xlu1 %324 }
 0x1c3   :  { %v340_v14 = vsel %vm3149_vm5, %v321_v15, %v325_v55  ;;  %v486_v15 = vmul.f32 %v3153_v54, %v464_v61  ;;  %v377_v61 = vsel %vm2245_vm0, %v357_v18, 0.0  ;;  %v3163_v18 = vld [vmem:[#allocation14_spill] sm:$0xff]  ;;  %vm3164_vm0 = vcmp.ge.s32.totalorder %v2191_v37, 1 }
 0x1c4   :  { %v358_v58 = vmul.f32 %v3148_v53, %v340_v14  ;;  %v3159_v14 = vld [vmem:[#allocation17_spill] sm:$0xff] }
 0x1c5   :  { %v684_v49 = vpop.permute.xlu0 %683 }
 0x1c6   :  { %v396_v56 = vpop.permute.xlu1 %395 }
 0x1c7   :  { %v399_v8 = vsel %vm3147_vm8, %v2197_v46, %v396_v56  ;;  %v405_v6 = vsel %vm3142_vm3, %v396_v56, %v384_v60  ;;  %v420_v46 = vmul.f32 %v3150_v52, %v401_v34  ;;  %v338_v60 = vsel %vm3152_vm11, %v325_v55, %v2173_v43  ;;  %vm3158_vm11 = vmmov %vm3154_vm15 }
 0x1c8   :  { %v421_v41 = vmul.f32 %v3150_v52, %v399_v8  ;;  %v483_v56 = vmul.f32 %v3153_v54, %v470_v42  ;;  %v533_v8 = vsel %vm3154_vm15, %v2351_v12, %v530_v47  ;;  %v418_v63 = vmul.f32 %v3150_v52, %v405_v6 }
 0x1c9   :  { %vm3155_vm8 = vcmp.ge.s32.totalorder %v2199_v40, 1  ;;  %vm3156_vm3 = vcmp.lt.s32.totalorder %v2116_v62, 15  ;;  %v359_v42 = vmul.f32 %v3148_v53, %v338_v60  ;;  %v539_v6 = vsel %vm3158_vm11, %v530_v47, %v2320_v19 }
 0x1ca   :  { %v453_v29 = vpop.permute.xlu1 %452  ;;  %v437_v34 = vsel %vm3155_vm8, %v421_v41, 0.0  ;;  %vm3157_vm5 = vmmov %vm3156_vm3  ;;  %v593_v52 = vmul.f32 %v1907_v23, %v3159_v14  ;;  %vm3161_vm15 = vcmp.ge.s32.totalorder %v2165_v59, 1  ;;  %vm3162_vm8 = vcmp.ge.s32.totalorder %v2171_v2, 1  ;;  %v3165_v41 = vld [vmem:[#allocation23_spill] sm:$0xff] }
 0x1cb   :  { %v466_v43 = vsel %vm3156_vm3, %v453_v29, %v2278_v9  ;;  %v468_v55 = vsel %vm3157_vm5, %v3145_v22, %v453_v29  ;;  %v435_v9 = vsel %vm3161_vm15, %v419_v27, 0.0  ;;  %v436_v22 = vsel %vm3162_vm8, %v420_v46, 0.0 }
 0x1cc   :  { %v484_v11 = vmul.f32 %v3153_v54, %v468_v55  ;;  %v555_v53 = vmul.f32 %v3163_v18, %v533_v8  ;;  %v434_v60 = vsel %vm3164_vm0, %v418_v63, 0.0  ;;  %v445_v47 = vadd.f32 %v437_v34, %v380_v57 }
 0x1cd   :  { %v485_v29 = vmul.f32 %v3153_v54, %v466_v43  ;;  %v503_v7 = vsel %vm2330_vm13, %v483_v56, 0.0  ;;  %v506_v27 = vsel %vm2338_vm10, %v486_v15, 0.0  ;;  %vm3166_vm1 = vnez %v3165_v41  ;;  %v745_v54 = vpop.permute.xlu0 %744  ;;  %vm3170_vm10 = vmmov %vm3158_vm11  ;;  %v3171_v15 = vld [vmem:[#allocation27_spill] sm:$0xff] }
 0x1ce   :  { %v522_v14 = vpop.permute.xlu1 %521  ;;  %v378_v46 = vsel %vm3166_vm1, %v358_v58, 0.0  ;;  %v552_v55 = vmul.f32 %v3163_v18, %v539_v6  ;;  %vm3168_vm3 = vnez %v3167_v10  ;;  %vm3169_vm5 = vcmp.lt.s32.totalorder %v2116_v62, 113  ;;  %v3173_v6 = vld [vmem:[#allocation28_spill] sm:$0xff] }
 0x1cf   :  { %v379_v8 = vsel %vm3168_vm3, %v359_v42, 0.0  ;;  %v687_v57 = vsel %vm3169_vm5, %v2445_v50, %v684_v49  ;;  %v535_v38 = vsel %vm3158_vm11, %v522_v14, %v2351_v12  ;;  %v537_v44 = vsel %vm3170_vm10, %v2320_v19, %v522_v14  ;;  %vm3175_vm8 = vmmov %vm3169_vm5 }
 0x1d0   :  { %v442_v56 = vadd.f32 %v434_v60, %v377_v61  ;;  %vm3172_vm13 = vnez %v3171_v15  ;;  %v553_v10 = vmul.f32 %v3163_v18, %v537_v44  ;;  %v554_v58 = vmul.f32 %v3163_v18, %v535_v38  ;;  %v3186_v15 = vld [vmem:[#allocation8_spill] sm:$0xff] }
 0x1d1   :  { %v504_v63 = vsel %vm3172_vm13, %v484_v11, 0.0  ;;  %v443_v34 = vadd.f32 %v435_v9, %v378_v46  ;;  %v571_v43 = vsel %vm2225_vm14, %v555_v53, 0.0  ;;  %v514_v42 = vadd.f32 %v506_v27, %v445_v47  ;;  %v3178_v11 = vld [vmem:[#allocation18_spill] sm:$0xff]  ;;  %v818_v14 = vpop.permute.xlu0 %817  ;;  %v3182_v27 = vld [vmem:[#allocation15_spill] sm:$0xff] }
 0x1d2   :  { %vm3174_vm15 = vnez %v3173_v6  ;;  %v611_v41 = vpop.permute.xlu1 %610  ;;  %v444_v28 = vadd.f32 %v436_v22, %v379_v8  ;;  %v693_v19 = vsel %vm3175_vm8, %v684_v49, %v2424_v26  ;;  %vm3176_vm0 = vnez %v3067_v36  ;;  %v3183_v8 = vld [vmem:[#allocation16_spill] sm:$0xff] }
 0x1d3   :  { %v505_v12 = vsel %vm3174_vm15, %v485_v29, 0.0  ;;  %v569_v61 = vsel %vm3176_vm0, %v553_v10, 0.0  ;;  %vm3177_vm1 = vcmp.lt.s32.totalorder %v2116_v62, 127  ;;  %v708_v32 = vmul.f32 %v3178_v11, %v687_v57  ;;  %vm3190_vm15 = vmmov %vm3175_vm8 }
 0x1d4   :  { %v624_v9 = vsel %vm3177_vm1, %v611_v41, %v2385_v35  ;;  %v512_v18 = vadd.f32 %v504_v63, %v443_v34  ;;  %vm3179_vm14 = vcmp.lt.s32.totalorder %v2116_v62, 112  ;;  %v570_v22 = vsel %vm2178_vm7, %v554_v58, 0.0  ;;  %vm3181_vm5 = vmmov %vm3177_vm1 }
 0x1d5   :  { %v758_v53 = vsel %vm3179_vm14, %v745_v54, %v2543_v24  ;;  %v511_v60 = vadd.f32 %v503_v7, %v442_v56  ;;  %v513_v47 = vadd.f32 %v505_v12, %v444_v28  ;;  %vm3180_vm3 = vmmov %vm3179_vm14  ;;  %v626_v49 = vsel %vm3181_vm5, %v2365_v20, %v611_v41 }
 0x1d6   :  { %v760_v36 = vsel %vm3180_vm3, %v2541_v31, %v745_v54  ;;  %v577_v29 = vadd.f32 %v569_v61, %v512_v18  ;;  %v642_v46 = vmul.f32 %v3182_v27, %v624_v9  ;;  %v595_v57 = vmul.f32 %v1907_v23, %v3183_v8  ;;  %v619_v38 = vpop.permute.xlu1 %618  ;;  %vm3185_vm11 = vmmov %vm3177_vm1  ;;  %v3193_v18 = vld [vmem:[#allocation9_spill] sm:$0xff] }
 0x1d7   :  { %v579_v17 = vadd.f32 %v571_v43, %v514_v42  ;;  %vm3184_vm7 = vnez %v3077_v33  ;;  %v709_v7 = vmul.f32 %v3178_v11, %v693_v19  ;;  %v578_v44 = vadd.f32 %v570_v22, %v513_v47  ;;  %vm3188_vm13 = vmmov %vm3177_vm1 }
 0x1d8   :  { %v568_v28 = vsel %vm3184_vm7, %v552_v55, 0.0  ;;  %v622_v54 = vsel %vm3185_vm11, %v2385_v35, %v619_v38  ;;  %v728_v56 = vsel %vm2459_vm9, %v708_v32, 0.0  ;;  %v775_v63 = vmul.f32 %v3186_v15, %v760_v36  ;;  %vm3189_vm9 = vmmov %vm3175_vm8 }
 0x1d9   :  { %v776_v10 = vmul.f32 %v3186_v15, %v758_v53  ;;  %v641_v23 = vmul.f32 %v3182_v27, %v626_v49  ;;  %vm3187_vm10 = vcmp.lt.s32.totalorder %v2116_v62, 111  ;;  %v576_v55 = vadd.f32 %v568_v28, %v511_v60  ;;  %v816_v49 = vpop.permute.xlu0 %815 }
 0x1da   :  { %v821_v33 = vsel %vm3187_vm10, %v2523_v0, %v818_v14  ;;  %v628_v58 = vsel %vm3188_vm13, %v619_v38, %v2365_v20  ;;  %v643_v35 = vmul.f32 %v3182_v27, %v622_v54  ;;  %v601_v34 = vadd.f32 %v593_v52, %v577_v29  ;;  %v676_v6 = vpop.permute.xlu1 %675  ;;  %vm3192_vm8 = vmmov %vm3187_vm10 }
 0x1db   :  { %v658_v25 = vsel %vm2274_vm2, %v642_v46, 0.0  ;;  %v603_v43 = vadd.f32 %v595_v57, %v579_v17  ;;  %v644_v42 = vmul.f32 %v3182_v27, %v628_v58  ;;  %v602_v12 = vadd.f32 %v2576_v45, %v578_v44  ;;  %vm3206_vm13 = vmmov %vm3192_vm8  ;;  %v3215_v58 = vld [vmem:[#allocation30_spill] sm:$0xff] }
 0x1dc   :  { %v659_v41 = vsel %vm2269_vm4, %v643_v35, 0.0  ;;  %v689_v19 = vsel %vm3189_vm9, %v676_v6, %v2445_v50  ;;  %v691_v20 = vsel %vm3190_vm15, %v2424_v26, %v676_v6  ;;  %v657_v21 = vsel %vm2316_vm6, %v641_v23, 0.0 }
 0x1dd   :  { %v660_v52 = vsel %vm2312_vm12, %v644_v42, 0.0  ;;  %v706_v61 = vmul.f32 %v3178_v11, %v691_v20  ;;  %v707_v45 = vmul.f32 %v3178_v11, %v689_v19  ;;  %vm3191_vm2 = vnez %v3118_v16 }
 0x1de   :  { %v729_v9 = vsel %vm3191_vm2, %v709_v7, 0.0  ;;  %v827_v50 = vsel %vm3192_vm8, %v818_v14, %v2487_v51  ;;  %v600_v32 = vadd.f32 %v2557_v1, %v576_v55  ;;  %v667_v26 = vadd.f32 %v659_v41, %v602_v12  ;;  %v753_v11 = vpop.permute.xlu1 %752  ;;  %vm3210_vm2 = vmmov %vm3192_vm8  ;;  %v3213_v55 = vld [vmem:[#allocation29_spill] sm:$0xff] }
 0x1df   :  { %v842_v48 = vmul.f32 %v3193_v18, %v821_v33  ;;  %v668_v53 = vadd.f32 %v660_v52, %v603_v43  ;;  %vm3194_vm6 = vnez %v3109_v3  ;;  %vm3195_vm0 = vnez %v3111_v4 }
 0x1e0   :  { %v726_v22 = vsel %vm3194_vm6, %v706_v61, 0.0  ;;  %v727_v60 = vsel %vm3195_vm0, %v707_v45, 0.0  ;;  %vm3196_vm1 = vcmp.le.s32.totalorder %v2191_v37, 14  ;;  %vm3197_vm14 = vcmp.le.s32.totalorder %v2171_v2, 14 }
 0x1e1   :  { %v791_v16 = vsel %vm3196_vm1, %v775_v63, 0.0  ;;  %vm2720_vm3 = vmand %vm3197_vm14, %vm2269_vm4  ;;  %v665_v47 = vadd.f32 %v657_v21, %v600_v32  ;;  %v666_v36 = vadd.f32 %v658_v25, %v601_v34  ;;  %vm3200_vm5 = vcmp.lt.s32.totalorder %v2116_v62, 112  ;;  %v3217_v34 = vld [vmem:[#allocation19_spill] sm:$0xff]  ;;  %v3219_v32 = vld [vmem:[#allocation32_spill] sm:$0xff] }
 0x1e2   :  { %v756_v3 = vsel %vm3200_vm5, %v2543_v24, %v753_v11  ;;  %vm3201_vm7 = vcmp.le.s32.totalorder %v2165_v59, 14  ;;  %v843_v37 = vmul.f32 %v3193_v18, %v827_v50  ;;  %vm3202_vm11 = vmmov %vm3200_vm5  ;;  %v736_v46 = vadd.f32 %v728_v56, %v667_v26  ;;  %v810_v17 = vpop.permute.xlu1 %809 }
 0x1e3   :  { %v792_v4 = vsel %vm3201_vm7, %v776_v10, 0.0  ;;  %v762_v39 = vsel %vm3202_vm11, %v753_v11, %v2541_v31  ;;  %v777_v29 = vmul.f32 %v3186_v15, %v756_v3  ;;  %v734_v14 = vadd.f32 %v726_v22, %v665_v47  ;;  %vm3207_vm9 = vmmov %vm3197_vm14  ;;  %v3221_v22 = vld [vmem:[#allocation34_spill] sm:$0xff] }
 0x1e4   :  { %v735_v27 = vadd.f32 %v727_v60, %v666_v36  ;;  %v778_v8 = vmul.f32 %v3186_v15, %v762_v39  ;;  %vm3203_vm4 = vcmp.le.s32.totalorder %v2199_v40, 14  ;;  %v862_v24 = vsel %vm2720_vm3, %v842_v48, 0.0  ;;  %v3220_v48 = vld [vmem:[#allocation33_spill] sm:$0xff] }
 0x1e5   :  { %vm2739_vm10 = vmand %vm3203_vm4, %vm2312_vm12  ;;  %v820_v31 = vsel %vm3206_vm13, %v2140_v13, %v816_v49  ;;  %v737_v57 = vadd.f32 %v729_v9, %v668_v53  ;;  %v793_v38 = vsel %vm3207_vm9, %v777_v29, 0.0  ;;  %v825_v44 = vsel %vm3210_vm2, %v2487_v51, %v810_v17  ;;  %v3218_v9 = vld [vmem:[#allocation31_spill] sm:$0xff] }
 0x1e6   :  { %vm3208_vm15 = vmmov %vm3203_vm4  ;;  %v801_v28 = vadd.f32 %v793_v38, %v736_v46  ;;  %v840_v2 = vmul.f32 %v3193_v18, %v825_v44  ;;  %v863_v40 = vsel %vm2739_vm10, %v843_v37, 0.0  ;;  %v799_v63 = vadd.f32 %v791_v16, %v734_v14 }
 0x1e7   :  { %v794_v30 = vsel %vm3208_vm15, %v778_v8, 0.0  ;;  %vm3209_vm12 = vmmov %vm3192_vm8  ;;  %v800_v10 = vadd.f32 %v792_v4, %v735_v27  ;;  %vm3214_vm6 = vnez %v3213_v55  ;;  %vm3216_vm0 = vnez %v3215_v58 }
 0x1e8   :  { %v823_v7 = vsel %vm3209_vm12, %v810_v17, %v2523_v0  ;;  %vm3211_vm8 = vmmov %vm3210_vm2  ;;  %v802_v54 = vadd.f32 %v794_v30, %v737_v57  ;;  %v870_v15 = vadd.f32 %v862_v24, %v801_v28  ;;  %v3212_v0 = vld [vmem:[#allocation10_spill] sm:$0xff]  ;;  %v860_v51 = vsel %vm3214_vm6, %v840_v2, 0.0  ;;  %v3223_v2 = vld [vmem:[#allocation21_spill] sm:$0xff] }
 0x1e9   :  { %v826_v13 = vsel %vm3211_vm8, %v816_v49, %v2121_v5  ;;  %v841_v56 = vmul.f32 %v3193_v18, %v823_v7  ;;  %v838_v23 = vmul.f32 %v3212_v0, %v820_v31  ;;  %v868_v43 = vadd.f32 %v860_v51, %v799_v63  ;;  %v3222_v7 = vld [vmem:[#allocation20_spill] sm:$0xff] }
 0x1ea   :  { %v871_v33 = vadd.f32 %v863_v40, %v802_v54  ;;  %v839_v35 = vmul.f32 %v3212_v0, %v826_v13  ;;  %v2772_v25 = vadd.f32 %v3217_v34, %v870_v15  ;;  %v296_v28 = vshra.s32 %v2116_v62, 8  ;;  %v3226_v0 = vld [vmem:[#allocation22_spill] sm:$0xff] }
 0x1eb   :  { %v861_v5 = vsel %vm3216_vm0, %v841_v56, 0.0  ;;  %v886_v41 = vadd.f32 %v3217_v34, %v868_v43  ;;  %v858_v20 = vsel %vm2720_vm3, %v838_v23, 0.0  ;;  %v297_v44 = vshra.s32 %v3222_v7, 8 }
 0x1ec   :  { %v869_v42 = vadd.f32 %v861_v5, %v800_v10  ;;  %v2775_v6 = vadd.f32 %v3217_v34, %v871_v33  ;;  %v1596_v12 = vmul.f32 -1.442695, %v2772_v25  ;;  %v859_v52 = vsel %vm2739_vm10, %v839_v35, 0.0 }
 0x1ed   :  { %v1594_v61 = vmul.f32 -1.442695, %v886_v41  ;;  %v866_v50 = vadd.f32 %v858_v20, %v3218_v9  ;;  %v867_v26 = vadd.f32 %v859_v52, %v3219_v32  ;;  %v298_v56 = vshra.s32 %v3223_v2, 8  ;;  %v947_v2 = vld [vmem:[%s2987_s4] sm:$0xff] }
 0x1ee   :  { %v887_v19 = vadd.f32 %v3217_v34, %v869_v42  ;;  %v1597_v21 = vmul.f32 -1.442695, %v2775_v6  ;;  %1717 = vpow2.f32 %v1596_v12  ;;  %vm2801_vm1 = vcmp.eq.s32.totalorder %v296_v28, 0  ;;  %v1393_v42 = vld [vmem:[%s2988_s5] sm:$0xf] }
 0x1ef   :  { %v875_v18 = vpop.permute.xlu1 %874  ;;  %v299_v23 = vshra.s32 %v3226_v0, 8  ;;  %vm2808_vm14 = vcmp.eq.s32.totalorder %v297_v44, 0  ;;  %vm2817_vm3 = vcmp.eq.s32.totalorder %v298_v56, 0  ;;  %vm2837_vm7 = vcmp.eq.s32.totalorder %v296_v28, 1  ;;  %v946_v28 = vld [vmem:[%s2986_s3] sm:$0xf] }
 0x1f0   :  { %v1595_v45 = vmul.f32 -1.442695, %v887_v19  ;;  %1719 = vpow2.f32 %v1597_v21  ;;  %v882_v53 = vadd.f32 %v875_v18, %v3220_v48  ;;  %v2789_v60 = vadd.f32 %v875_v18, %v3221_v22 }
 0x1f1   :  { %1721 = vpow2.f32 %v1594_v61  ;;  %v2791_v11 = vadd.f32 %v875_v18, %v866_v50  ;;  %v2793_v16 = vadd.f32 %v875_v18, %v867_v26  ;;  %vm2830_vm5 = vcmp.eq.s32.totalorder %v299_v23, 0 }
 0x1f2   :  { %1723 = vpow2.f32 %v1595_v45  ;;  %v1590_v1 = vmul.f32 -1.442695, %v882_v53  ;;  %v1591_v47 = vmul.f32 -1.442695, %v2789_v60  ;;  %vm2841_vm11 = vcmp.eq.s32.totalorder %v297_v44, 1 }
 0x1f3   :  { %v1592_v36 = vmul.f32 -1.442695, %v2791_v11  ;;  %v1593_v49 = vmul.f32 -1.442695, %v2793_v16  ;;  %vm2877_vm4 = vcmp.eq.s32.totalorder %v298_v56, 1  ;;  %vm2887_vm10 = vcmp.eq.s32.totalorder %v299_v23, 1 }
 0x1f4   :  { %1725 = vpow2.f32 %v1590_v1  ;;  %vm1815_vm13 = vmmov 0   ;;  %vm981_vm9 = vcmask 130048   ;;  %vm3242_vm15 = vcmask 31744   ;;  %v31_v56 = vld [vmem:[%s2989_s6 + $0x20] sm:$0xf] }
 0x1f5   :  { %1727 = vpow2.f32 %v1591_v47  ;;  %1635 = vmatprep.mubr.msk.f32.mxu1 %vm3242_vm15, %v947_v2  ;;  %vm3243_vm12 = vcmask 1043456   ;;  %vm3245_vm8 = vmmov %vm3242_vm15 }
 0x1f6   :  { %1729 = vpow2.f32 %v1592_v36  ;;  %vm3244_vm2 = vmmov %vm3243_vm12 }
 0x1f7   :  { %1731 = vpow2.f32 %v1593_v49  ;;  %vm3246_vm6 = vmmov %vm3245_vm8 }
 0x1f8   :  { %vm3247_vm0 = vmmov %vm3244_vm2 }
 0x1fb   :  { %v1718_v3 = vpop.eup %1717 }
 0x1fc   :  { %v920_v37 = vadd.f32 1.0, %v1718_v3 }
 0x1fd   :  { %v1720_v4 = vpop.eup %1719 }
 0x1fe   :  { %v1722_v39 = vpop.eup %1721  ;;  %v921_v29 = vadd.f32 1.0, %v1720_v4  ;;  %1733 = vrcp.f32 %v920_v37 }
 0x1ff   :  { %v1724_v14 = vpop.eup %1723  ;;  %v918_v27 = vadd.f32 1.0, %v1722_v39 }
 0x200   :  { %v919_v46 = vadd.f32 1.0, %v1724_v14  ;;  %1735 = vrcp.f32 %v921_v29 }
 0x201   :  { %1737 = vrcp.f32 %v918_v27  ;;  %v1726_v8 = vpop.eup %1725 }
 0x202   :  { %1739 = vrcp.f32 %v919_v46  ;;  %v1728_v59 = vpop.eup %1727  ;;  %v914_v24 = vadd.f32 1.0, %v1726_v8 }
 0x203   :  { %v1730_v31 = vpop.eup %1729  ;;  %v915_v57 = vadd.f32 1.0, %v1728_v59 }
 0x204   :  { %v1732_v38 = vpop.eup %1731  ;;  %v916_v17 = vadd.f32 1.0, %v1730_v31  ;;  %1741 = vrcp.f32 %v914_v24  ;;  %v3241_v31 = vmov 0.0  }
 0x205   :  { %v917_v30 = vadd.f32 1.0, %v1732_v38  ;;  %1743 = vrcp.f32 %v915_v57  ;;  %1630 = vmatprep.mubr.msk.f32.mxu0 %vm1815_vm13, %v3241_v31 }
 0x206   :  { %1745 = vrcp.f32 %v916_v17 }
 0x207   :  { %1747 = vrcp.f32 %v917_v30 }
 0x20b   :  { %v1734_v13 = vpop.eup %1733 }
 0x20c   :  { %v2815_v55 = vmul.f32 %v1734_v13, %v2772_v25 }
 0x20d   :  { %v1736_v54 = vpop.eup %1735 }
 0x20e   :  { %v1738_v40 = vpop.eup %1737  ;;  %v2825_v5 = vmul.f32 %v1736_v54, %v2775_v6  ;;  %v967_v43 = vsel %vm2817_vm3, %v2815_v55, 0.0  ;;  %v1176_v14 = vsel %vm2877_vm4, %v2815_v55, 0.0 }
 0x20f   :  { %v1740_v63 = vpop.eup %1739  ;;  %v2805_v10 = vmul.f32 %v1738_v40, %v886_v41 }
 0x210   :  { %v2812_v62 = vmul.f32 %v1740_v63, %v887_v19  ;;  %v968_v21 = vsel %vm2830_vm5, %v2825_v5, 0.0  ;;  %v1177_v59 = vsel %vm2887_vm10, %v2825_v5, 0.0 }
 0x211   :  { %v965_v58 = vsel %vm2801_vm1, %v2805_v10, 0.0  ;;  %v1742_v12 = vpop.eup %1741  ;;  %v1174_v9 = vsel %vm2837_vm7, %v2805_v10, 0.0 }
 0x212   :  { %v966_v35 = vsel %vm2808_vm14, %v2812_v62, 0.0  ;;  %v1744_v19 = vpop.eup %1743  ;;  %v2845_v20 = vmul.f32 %v1742_v12, %v882_v53  ;;  %v1175_v50 = vsel %vm2841_vm11, %v2812_v62, 0.0 }
 0x213   :  { %v974_v25 = vadd.f32 %v966_v35, %v965_v58  ;;  %v1746_v52 = vpop.eup %1745  ;;  %v2851_v61 = vmul.f32 %v1744_v19, %v2789_v60  ;;  %v1183_v36 = vadd.f32 %v1175_v50, %v1174_v9  ;;  %v948_v19 = vld [vmem:[%s2987_s4 + $0x8] sm:$0xff] }
 0x214   :  { %v1748_v32 = vpop.eup %1747  ;;  %v2860_v26 = vmul.f32 %v1746_v52, %v2791_v11  ;;  %v1170_v18 = vsel %vm2837_vm7, %v2845_v20, 0.0  ;;  %v961_v48 = vsel %vm2801_vm1, %v2845_v20, 0.0  ;;  %vm3248_vm1 = vmmov %vm3247_vm0 }
 0x215   :  { %v975_v41 = vadd.f32 %v974_v25, %v967_v43  ;;  %v2869_v53 = vmul.f32 %v1748_v32, %v2793_v16  ;;  %v1171_v22 = vsel %vm2841_vm11, %v2851_v61, 0.0  ;;  %v962_v60 = vsel %vm2808_vm14, %v2851_v61, 0.0  ;;  %vm3249_vm14 = vmmov %vm3246_vm6  ;;  %v32_v32 = vld [vmem:[%s2989_s6 + $0x28] sm:$0xff] }
 0x216   :  { %v1178_v1 = vadd.f32 %v1171_v22, %v1170_v18  ;;  %v969_v47 = vadd.f32 %v962_v60, %v961_v48  ;;  %v1172_v16 = vsel %vm2877_vm4, %v2860_v26, 0.0  ;;  %v963_v49 = vsel %vm2817_vm3, %v2860_v26, 0.0 }
 0x217   :  { %v976_v45 = vadd.f32 %v975_v41, %v968_v21  ;;  %v1173_v39 = vsel %vm2887_vm10, %v2869_v53, 0.0  ;;  %v964_v29 = vsel %vm2830_vm5, %v2869_v53, 0.0  ;;  %v1184_v8 = vadd.f32 %v1183_v36, %v1176_v14 }
 0x218   :  { %v1179_v4 = vadd.f32 %v1178_v1, %v1172_v16  ;;  %v970_v37 = vadd.f32 %v969_v47, %v963_v49 }
 0x219   :  { %977 = vadd.xlane.f32.xlu1 %v976_v45  ;;  %v1185_v24 = vadd.f32 %v1184_v8, %v1177_v59  ;;  %v33_v45 = vld [vmem:[%s2989_s6 + $0x30] sm:$0xff] }
 0x21a   :  { %v1180_v27 = vadd.f32 %v1179_v4, %v1173_v39  ;;  %v971_v46 = vadd.f32 %v970_v37, %v964_v29 }
 0x21c   :  { %972 = vadd.xlane.f32.xlu0 %v971_v46 }
 0x21d   :  { %1181 = vadd.xlane.f32.xlu1 %v1180_v27 }
 0x220   :  { %1186 = vadd.xlane.f32.xlu0 %v1185_v24 }
 0x2a2   :  { %v978_v57 = vpop.xlane.xlu1 %977 }
 0x2a3   :  { %v980_v38 = vmul.f32 0.00390625, %v978_v57 }
 0x2a5   :  { %1627 = vmatpush3.msra.mxu0 %v980_v38  ;;  %v973_v17 = vpop.xlane.xlu0 %972 }
 0x2a6   :  { %1628 = vmatprep.subr.mxu0 %v3241_v31  ;;  %v979_v30 = vmul.f32 0.00390625, %v973_v17  ;;  %v1182_v7 = vpop.xlane.xlu1 %1181  ;;  %v34_v17 = vld [vmem:[%s2989_s6 + $0x38] sm:$0xf] }
 0x2a7   :  { %v1188_v54 = vmul.f32 0.00390625, %v1182_v7 }
 0x2a8   :  { %1629 = vmatpush3.msra.mxu0 %v979_v30 }
 0x2a9   :  { %1631 = vmatmul.mubr.msk.f32.vlgmr.msra.gmra.mxu0 %vm981_vm9, %v946_v28  ;;  %v1187_v44 = vpop.xlane.xlu0 %1186  ;;  %1638 = vmatprep.subr.mxu0 %v3241_v31 }
 0x2aa   :  { %v1189_v13 = vmul.f32 0.00390625, %v1187_v44  ;;  %1642 = vmatprep.mubr.msk.f32.mxu0 %vm1815_vm13, %v3241_v31 }
 0x2ac   :  { %1639 = vmatpush3.msra.mxu0 %v1189_v13 }
 0x2ad   :  { %1640 = vmatprep.subr.mxu0 %v3241_v31 }
 0x2ae   :  { %1641 = vmatpush3.msra.mxu0 %v1188_v54 }
 0x2af   :  { %1643 = vmatmul.mubr.msk.f32.vlgmr.msra.gmra.mxu0 %vm981_vm9, %v946_v28 }
 0x2b0   :  { %1466 = vmatprep.mubr.f32.mxu0 %v3241_v31 }
 0x369   :  { %v1051_v40 = vpop.f32.mrf.mxu0 }
 0x36a   :  { %v1052_v15 = vadd.f32 %v1051_v40, %v31_v56 }
 0x36b   :  { %v1632_v63 = vpop.f32.mrf.mxu0 }
 0x36c   :  { %v1599_v0 = vmul.f32 -1.442695, %v1052_v15 }
 0x36e   :  { %1749 = vpow2.f32 %v1599_v0 }
 0x36f   :  { %v1256_v23 = vpop.f32.mrf.mxu0 }
 0x370   :  { %v1257_v33 = vadd.f32 %v1256_v23, %v31_v56 }
 0x371   :  { %v1644_v51 = vpop.f32.mrf.mxu0 }
 0x372   :  { %v1606_v58 = vmul.f32 -1.442695, %v1257_v33 }
 0x374   :  { %1751 = vpow2.f32 %v1606_v58 }
 0x37b   :  { %v1750_v35 = vpop.eup %1749 }
 0x37c   :  { %v1058_v34 = vadd.f32 1.0, %v1750_v35 }
 0x37e   :  { %1753 = vrcp.f32 %v1058_v34 }
 0x381   :  { %v1752_v25 = vpop.eup %1751 }
 0x382   :  { %v1263_v43 = vadd.f32 1.0, %v1752_v25  ;;  %v1773_v25 = vld [vmem:[%s2983_s0] sm:$0xff] }
 0x384   :  { %1755 = vrcp.f32 %v1263_v43 }
 0x38b   :  { %v1754_v12 = vpop.eup %1753 }
 0x38c   :  { %v1061_v41 = vmul.f32 %v1754_v12, %v1052_v15  ;;  %v1774_v12 = vld [vmem:[%s2983_s0 + $0x8] sm:$0xff] }
 0x38e   :  { %1633 = vmatprep.subr.msk.mxu1 %vm3243_vm12, %v1061_v41 }
 0x38f   :  { %1634 = vmatpush3.msk.msra.mxu1 %vm3244_vm2, %v1061_v41 }
 0x390   :  { %1636 = vmatmul.mubr.msk.f32.vlgmr.msra.gmra.mxu1 %vm3245_vm8, %v948_v19 }
 0x391   :  { %v1756_v21 = vpop.eup %1755  ;;  %1647 = vmatprep.mubr.msk.f32.mxu1 %vm3246_vm6, %v947_v2 }
 0x392   :  { %v1266_v52 = vmul.f32 %v1756_v21, %v1257_v33 }
 0x394   :  { %1645 = vmatprep.subr.msk.mxu1 %vm3247_vm0, %v1266_v52 }
 0x395   :  { %1646 = vmatpush3.msk.msra.mxu1 %vm3248_vm1, %v1266_v52  ;;  %v3251_v52 = vld [vmem:[#allocation6_spill] sm:$0xff] }
 0x396   :  { %1648 = vmatmul.mubr.msk.f32.vlgmr.msra.gmra.mxu1 %vm3249_vm14, %v948_v19  ;;  %v3250_v19 = vld [vmem:[#allocation5_spill] sm:$0xff] }
 0x397   :  { %1537 = vmatprep.mubr.f32.mxu1 %v3241_v31 }
 0x450   :  { %v1637_v9 = vpop.f32.mrf.mxu1 }
 0x451   :  { %v1143_v50 = vadd.f32 %v1637_v9, %v33_v45 }
 0x452   :  { %v1137_v18 = vpop.f32.mrf.mxu1 }
 0x453   :  { %v1604_v48 = vmul.f32 -1.442695, %v1143_v50  ;;  %v1138_v22 = vadd.f32 %v1137_v18, %v32_v32 }
 0x455   :  { %1757 = vpow2.f32 %v1604_v48  ;;  %v1603_v47 = vmul.f32 -1.442695, %v1138_v22 }
 0x456   :  { %v1649_v60 = vpop.f32.mrf.mxu1 }
 0x457   :  { %v1342_v1 = vadd.f32 %v1649_v60, %v33_v45 }
 0x458   :  { %v1336_v36 = vpop.f32.mrf.mxu1 }
 0x459   :  { %v1611_v16 = vmul.f32 -1.442695, %v1342_v1  ;;  %v1337_v49 = vadd.f32 %v1336_v36, %v32_v32 }
 0x45b   :  { %1759 = vpow2.f32 %v1611_v16  ;;  %v1610_v4 = vmul.f32 -1.442695, %v1337_v49 }
 0x45c   :  { %1761 = vpow2.f32 %v1603_v47 }
 0x45d   :  { %1763 = vpow2.f32 %v1610_v4 }
 0x462   :  { %v1758_v37 = vpop.eup %1757 }
 0x463   :  { %v1153_v39 = vadd.f32 1.0, %v1758_v37 }
 0x465   :  { %1765 = vrcp.f32 %v1153_v39 }
 0x468   :  { %v1760_v29 = vpop.eup %1759 }
 0x469   :  { %v1762_v14 = vpop.eup %1761  ;;  %v1352_v27 = vadd.f32 1.0, %v1760_v29 }
 0x46a   :  { %v1764_v46 = vpop.eup %1763  ;;  %v1152_v59 = vadd.f32 1.0, %v1762_v14 }
 0x46b   :  { %1767 = vrcp.f32 %v1352_v27  ;;  %v1351_v8 = vadd.f32 1.0, %v1764_v46 }
 0x46d   :  { %1769 = vrcp.f32 %v1351_v8 }
 0x46e   :  { %1771 = vrcp.f32 %v1152_v59 }
 0x472   :  { %v1766_v24 = vpop.eup %1765 }
 0x473   :  { %1374 = vperm.xlu1 %1682, %v1766_v24  }
 0x478   :  { %v1768_v31 = vpop.eup %1767 }
 0x479   :  { %1364 = vperm.xlu0 %1681, %v1768_v31  }
 0x47a   :  { %v1770_v57 = vpop.eup %1769 }
 0x47b   :  { %1359 = vperm.xlu1 %1682, %v1770_v57   ;;  %v1772_v38 = vpop.eup %1771 }
 0x47f   :  { %1369 = vperm.xlu1 %1682, %v1772_v38  }
 0x483   :  { %1396 = vperm.xlu1 %1682, %v34_v17  }
 0x4ee   :  { %v1375_v30 = vpop.permute.xlu1 %1374 }
 0x4f4   :  { %v1365_v28 = vpop.permute.xlu0 %1364 }
 0x4f5   :  { %v1381_v7 = vsel %vm2837_vm7, %v1365_v28, %v1375_v30  ;;  %v1382_v44 = vsel %vm2841_vm11, %v1365_v28, %v1375_v30  ;;  %v1383_v13 = vsel %vm2877_vm4, %v1365_v28, %v1375_v30  ;;  %v1384_v54 = vsel %vm2887_vm10, %v1365_v28, %v1375_v30 }
 0x4f6   :  { %v1389_v2 = vmul.f32 %v1381_v7, %v2805_v10  ;;  %v1391_v56 = vmul.f32 %v1383_v13, %v2815_v55  ;;  %v1360_v40 = vpop.permute.xlu1 %1359  ;;  %v1390_v15 = vmul.f32 %v1382_v44, %v2812_v62  ;;  %v1392_v63 = vmul.f32 %v1384_v54, %v2825_v5 }
 0x4f8   :  { %1430 = vmatprep.subr.mxu0 %v1390_v15  ;;  %1501 = vmatprep.subr.mxu1 %v1392_v63 }
 0x4f9   :  { %1431 = vmatpush1.msra.mxu0 %v1389_v2  ;;  %1502 = vmatpush1.msra.mxu1 %v1391_v56 }
 0x4fa   :  { %v1370_v0 = vpop.permute.xlu1 %1369 }
 0x4fb   :  { %v1377_v23 = vsel %vm2837_vm7, %v1360_v40, %v1370_v0  ;;  %v1379_v33 = vsel %vm2877_vm4, %v1360_v40, %v1370_v0  ;;  %v1378_v10 = vsel %vm2841_vm11, %v1360_v40, %v1370_v0  ;;  %v1380_v55 = vsel %vm2887_vm10, %v1360_v40, %v1370_v0 }
 0x4fc   :  { %v1385_v62 = vmul.f32 %v1377_v23, %v2845_v20  ;;  %v1387_v5 = vmul.f32 %v1379_v33, %v2860_v26  ;;  %v1386_v51 = vmul.f32 %v1378_v10, %v2851_v61  ;;  %v1388_v58 = vmul.f32 %v1380_v55, %v2869_v53 }
 0x4fe   :  { %1432 = vmatprep.subr.mxu0 %v1386_v51  ;;  %1503 = vmatprep.subr.mxu1 %v1388_v58  ;;  %v1397_v6 = vpop.permute.xlu1 %1396 }
 0x4ff   :  { %1433 = vmatpush1.msra.mxu0 %v1385_v62  ;;  %1504 = vmatpush1.msra.mxu1 %v1387_v5 }
 0x500   :  { %1612 = vmatmul.mubr.msk.f32.vlgmr.msra.gmra.mxu0 %vm981_vm9, %v1393_v42  ;;  %1613 = vmatmul.mubr.msk.f32.vlgmr.msra.gmra.mxu1 %vm981_vm9, %v1393_v42 }
 0x5c0   :  { %v1468_v20 = vpop.f32.mrf.mxu0  ;;  %v1539_v11 = vpop.f32.mrf.mxu1 }
 0x5c1   :  { %v1469_v26 = vadd.f32 %v1468_v20, %v1397_v6  ;;  %v1540_v3 = vadd.f32 %v1539_v11, %v1397_v6 }
 0x5c2   :  { %v1470_v61 = vpop.f32.mrf.mxu0  ;;  %v1541_v35 = vpop.f32.mrf.mxu1 }
 0x5c3   :  { %v1471_v53 = vadd.f32 %v1470_v61, %v1397_v6  ;;  %v1542_v34 = vadd.f32 %v1541_v35, %v1397_v6  ;;  %v1546_v43 = vadd.f32 %v1773_v25, %v1469_v26  ;;  %v1548_v41 = vadd.f32 %v1774_v12, %v1540_v3 }
 0x5c5   :  { %v1547_v21 = vadd.f32 %v1471_v53, %v3250_v19  ;;  %v1549_v45 = vadd.f32 %v1542_v34, %v3251_v52 }
 0x5c7   :  { %v1554_v9 = vcombine.low %v1546_v43, %v1547_v21  ;;  %v1555_v50 = vcombine.low %v1548_v41, %v1549_v45 }
 0x5c9   :  { %1558 = vst [vmem:[#allocation2] sm:$0xff] %v1554_v9  ;;  %1559 = vst [vmem:[#allocation2 + $0x8] sm:$0xff] %v1555_v50 }
 0x5ca   :  { %1786 = shalt.err (!%p1783_p4)
}
 0x5cb   :  { %1569 = dma.vmem_to_hbm [thread:$0]  %s1567_s16, 256, %s2990_s7, [#allocation3]  }
 0x5cc   :  { %1795 = dma.done.wait [#allocation3], 256  }
 0x5cd   :  { %1796 = vsyncadd [#allocation3], 4294967040 }
 0x5ce   :  { %1573 = vsyncpa [#allocation3], 1 }

</bundles_post_ra>
